<compile_context>
chip_gen: v6e
topology: v6e:2x2x1
jax: 0.10.0
libtpu: 0.0.40
codegen_flags: <defaults>
</compile_context>

<pallas_src>
import numpy as np

import jax
import jax.numpy as jnp
from jax.experimental import pallas as pl
from jax.experimental.pallas import tpu as pltpu


# ---------------------------------------------------------------------------
# Fused Pallas kernel: one batch sample end-to-end
# ---------------------------------------------------------------------------
def _lenet5_fused_kernel(
    x_ref,      # (32, 32)        one sample (single input channel)
    t1_ref,     # (5, 32, 168)    conv1 row-shift Toeplitz weights
    b1c_ref,    # (1, 168)        conv1 bias, repeated per output column
    pl1_ref,    # (14, 28)        pool1 row-pool matrix (0.5 entries)
    pr1_ref,    # (168, 84)       pool1 col/channel-block pool matrix
    t2_ref,     # (5, 84, 160)    conv2 row-shift Toeplitz weights
    b2c_ref,    # (1, 160)
    pl2_ref,    # (5, 10)
    pr2_ref,    # (160, 80)
    w1_ref,     # (5, 80, 128)    fc1, flatten-permutation absorbed, padded
    b1_ref,     # (1, 128)
    w2_ref,     # (128, 128)      fc2, zero padded
    b2_ref,     # (1, 128)
    w3_ref,     # (128, 128)      fc3, zero padded
    b3_ref,     # (1, 128)
    o_ref,      # (1, 128)        padded logits
):
    f32 = jnp.float32
    x = x_ref[...]                                                  # (32, 32)

    # conv1 (1->6, k=5, valid) + ReLU; layout (row, cout*28 + col)
    y = jnp.zeros((28, 168), f32)
    for di in range(5):
        y = y + jnp.dot(x[di:di + 28, :], t1_ref[di],
                        preferred_element_type=f32)
    y = jnp.maximum(y + b1c_ref[...], 0.0)                          # (28, 168)

    # pool1: 2x2 avg stride 2 as two constant matmuls
    y = jnp.dot(pl1_ref[...], y, preferred_element_type=f32)        # (14, 168)
    y = jnp.dot(y, pr1_ref[...], preferred_element_type=f32)        # (14, 84)

    # conv2 (6->16, k=5, valid) + ReLU; layout (row, cout*10 + col)
    z = jnp.zeros((10, 160), f32)
    for di in range(5):
        z = z + jnp.dot(y[di:di + 10, :], t2_ref[di],
                        preferred_element_type=f32)
    z = jnp.maximum(z + b2c_ref[...], 0.0)                          # (10, 160)

    # pool2
    z = jnp.dot(pl2_ref[...], z, preferred_element_type=f32)        # (5, 160)
    z = jnp.dot(z, pr2_ref[...], preferred_element_type=f32)        # (5, 80)

    # fc1 (+ReLU): torch flatten permutation is baked into w1 (5, 80, 128)
    h = b1_ref[...]                                                 # (1, 128)
    for r in range(5):
        h = h + jnp.dot(z[r:r + 1, :], w1_ref[r],
                        preferred_element_type=f32)
    h = jnp.maximum(h, 0.0)

    # fc2 (+ReLU), fc3 — all widths zero-padded to 128 lanes
    h = jnp.maximum(
        jnp.dot(h, w2_ref[...], preferred_element_type=f32) + b2_ref[...], 0.0)
    o = jnp.dot(h, w3_ref[...], preferred_element_type=f32) + b3_ref[...]
    o_ref[...] = o.astype(o_ref.dtype)


def lenet5_forward(x, prep):
    """x: (B, 1, 32, 32) float32 NCHW -> logits (B, 10)."""
    B = x.shape[0]
    x2 = x.reshape(B, 32, 32)

    def full_spec(a):
        return pl.BlockSpec(a.shape, lambda b, _n=a.ndim: (0,) * _n)

    order = ("t1", "b1c", "pl1", "pr1", "t2", "b2c", "pl2", "pr2",
             "w1", "b1", "w2", "b2", "w3", "b3")
    weights = [prep[k] for k in order]

    out = pl.pallas_call(
        _lenet5_fused_kernel,
        out_shape=jax.ShapeDtypeStruct((B, 1, 128), jnp.float32),
        grid=(B,),
        in_specs=[pl.BlockSpec((None, 32, 32), lambda b: (b, 0, 0))]
                 + [full_spec(w) for w in weights],
        out_specs=pl.BlockSpec((None, 1, 128), lambda b: (b, 0, 0)),
        compiler_params=pltpu.CompilerParams(
            dimension_semantics=("parallel",)),
    )(x2, *weights)
    return out[:, 0, :10]


# ---------------------------------------------------------------------------
# One-time host-side parameter preparation (hoisted out of the forward)
# ---------------------------------------------------------------------------
def prepare_params(params):
    def np32(a):
        return np.asarray(a, dtype=np.float32)

    def conv_toeplitz(w, w_out):
        # w: (Cout, Cin, kh, kw). T[di][ci*w_in + j + dj, co*w_out + j] = w[co,ci,di,dj]
        cout, cin, kh, kw = w.shape
        w_in = w_out + kw - 1
        T = np.zeros((kh, cin * w_in, cout * w_out), np.float32)
        for di in range(kh):
            for ci in range(cin):
                for co in range(cout):
                    for j in range(w_out):
                        T[di, ci * w_in + j: ci * w_in + j + kw,
                          co * w_out + j] = w[co, ci, di, :]
        return T

    def pool_left(n_out):
        L = np.zeros((n_out, 2 * n_out), np.float32)
        for p in range(n_out):
            L[p, 2 * p] = 0.5
            L[p, 2 * p + 1] = 0.5
        return L

    def pool_right(channels, n_out):
        n_in = 2 * n_out
        R = np.zeros((channels * n_in, channels * n_out), np.float32)
        for c in range(channels):
            for q in range(n_out):
                R[c * n_in + 2 * q, c * n_out + q] = 0.5
                R[c * n_in + 2 * q + 1, c * n_out + q] = 0.5
        return R

    def pad2(a, rows, cols):
        out = np.zeros((rows, cols), np.float32)
        out[: a.shape[0], : a.shape[1]] = a
        return out

    c1w, c1b = np32(params["conv1_w"]), np32(params["conv1_b"])
    c2w, c2b = np32(params["conv2_w"]), np32(params["conv2_b"])
    f1w, f1b = np32(params["fc1_w"]), np32(params["fc1_b"])
    f2w, f2b = np32(params["fc2_w"]), np32(params["fc2_b"])
    f3w, f3b = np32(params["fc3_w"]), np32(params["fc3_b"])

    # fc1: our flattened activation layout is (row h, c*5 + w); torch flatten
    # order is c*25 + h*5 + w — absorb the permutation into the weights.
    w1r = np.zeros((5, 80, 128), np.float32)
    for c in range(16):
        for h in range(5):
            for w in range(5):
                w1r[h, c * 5 + w, :120] = f1w[c * 25 + h * 5 + w, :]

    prep = {
        "t1": conv_toeplitz(c1w, 28),            # (5, 32, 168)
        "b1c": np.repeat(c1b, 28)[None, :],      # (1, 168)
        "pl1": pool_left(14),                    # (14, 28)
        "pr1": pool_right(6, 14),                # (168, 84)
        "t2": conv_toeplitz(c2w, 10),            # (5, 84, 160)
        "b2c": np.repeat(c2b, 10)[None, :],      # (1, 160)
        "pl2": pool_left(5),                     # (5, 10)
        "pr2": pool_right(16, 5),                # (160, 80)
        "w1": w1r,                               # (5, 80, 128)
        "b1": pad2(f1b[None, :], 1, 128),
        "w2": pad2(f2w, 128, 128),
        "b2": pad2(f2b[None, :], 1, 128),
        "w3": pad2(f3w, 128, 128),
        "b3": pad2(f3b[None, :], 1, 128),
    }
    return {k: jnp.asarray(v) for k, v in prep.items()}


# ---------------------------------------------------------------------------
# Parameter init (PyTorch-style uniform) and a pure-JAX reference
# ---------------------------------------------------------------------------
def _uniform(key, shape, fan_in):
    bound = 1.0 / np.sqrt(float(fan_in))
    return jax.random.uniform(key, shape, jnp.float32, -bound, bound)


def init_params(key):
    ks = jax.random.split(key, 10)
    return {
        "conv1_w": _uniform(ks[0], (6, 1, 5, 5), 25),
        "conv1_b": _uniform(ks[1], (6,), 25),
        "conv2_w": _uniform(ks[2], (16, 6, 5, 5), 150),
        "conv2_b": _uniform(ks[3], (16,), 150),
        # fc weights stored pre-transposed as (in, out) so y = x @ w + b
        "fc1_w": _uniform(ks[4], (400, 120), 400),
        "fc1_b": _uniform(ks[5], (120,), 400),
        "fc2_w": _uniform(ks[6], (120, 84), 120),
        "fc2_b": _uniform(ks[7], (84,), 120),
        "fc3_w": _uniform(ks[8], (84, 10), 84),
        "fc3_b": _uniform(ks[9], (10,), 84),
    }


def lenet5_reference(x, params):
    """Plain-XLA reference with identical semantics to the PyTorch module."""
    B = x.shape[0]
    dn = ("NCHW", "OIHW", "NCHW")
    y = jax.lax.conv_general_dilated(x, params["conv1_w"], (1, 1), "VALID",
                                     dimension_numbers=dn)
    y = jax.nn.relu(y + params["conv1_b"][None, :, None, None])
    y = y.reshape(B, 6, 14, 2, 14, 2).mean(axis=(3, 5))
    y = jax.lax.conv_general_dilated(y, params["conv2_w"], (1, 1), "VALID",
                                     dimension_numbers=dn)
    y = jax.nn.relu(y + params["conv2_b"][None, :, None, None])
    y = y.reshape(B, 16, 5, 2, 5, 2).mean(axis=(3, 5))
    flat = y.reshape(B, 400)
    h = jax.nn.relu(flat @ params["fc1_w"] + params["fc1_b"])
    h = jax.nn.relu(h @ params["fc2_w"] + params["fc2_b"])
    return h @ params["fc3_w"] + params["fc3_b"]


if __name__ == "__main__":
    key = jax.random.PRNGKey(0)
    params = init_params(key)
    prep = prepare_params(params)   # hoisted: done once, not per forward

    x = jax.random.normal(jax.random.fold_in(key, 123), (2, 1, 32, 32),
                          dtype=jnp.float32)

    fwd = jax.jit(lambda xx: lenet5_forward(xx, prep))
    out = fwd(x)
    jax.block_until_ready(out)

    assert out.shape == (2, 10), out.shape
    assert out.dtype == jnp.float32

    ref = lenet5_reference(x, params)
    np.testing.assert_allclose(np.asarray(out), np.asarray(ref),
                               atol=3e-2, rtol=3e-2)
    print("KERNEL_OK")
</pallas_src>

<mosaic_0001>
module attributes {stable_mosaic.version = 11 : i64} {
  func.func @_lenet5_fused_kernel(%arg0: i32, %arg1: memref<1x32x32xf32, #tpu.memory_space<vmem>>, %arg2: memref<5x32x168xf32, #tpu.memory_space<vmem>>, %arg3: memref<1x168xf32, #tpu.memory_space<vmem>>, %arg4: memref<14x28xf32, #tpu.memory_space<vmem>>, %arg5: memref<168x84xf32, #tpu.memory_space<vmem>>, %arg6: memref<5x84x160xf32, #tpu.memory_space<vmem>>, %arg7: memref<1x160xf32, #tpu.memory_space<vmem>>, %arg8: memref<5x10xf32, #tpu.memory_space<vmem>>, %arg9: memref<160x80xf32, #tpu.memory_space<vmem>>, %arg10: memref<5x80x128xf32, #tpu.memory_space<vmem>>, %arg11: memref<1x128xf32, #tpu.memory_space<vmem>>, %arg12: memref<128x128xf32, #tpu.memory_space<vmem>>, %arg13: memref<1x128xf32, #tpu.memory_space<vmem>>, %arg14: memref<128x128xf32, #tpu.memory_space<vmem>>, %arg15: memref<1x128xf32, #tpu.memory_space<vmem>>, %arg16: memref<1x1x128xf32, #tpu.memory_space<vmem>>) attributes {dimension_semantics = [#tpu.dimension_semantics<parallel>], iteration_bounds = array<i64: 2>, scalar_prefetch = 0 : i64, scratch_operands = 0 : i64, tpu.core_type = #tpu.core_type<tc>, window_params = [{transform_indices = @transform_0, window_bounds = array<i64: 1, 32, 32>}, {pipeline_mode = #tpu.pipeline_mode<synchronous>, transform_indices = @transform_1, window_bounds = array<i64: 5, 32, 168>}, {pipeline_mode = #tpu.pipeline_mode<synchronous>, transform_indices = @transform_2, window_bounds = array<i64: 1, 168>}, {pipeline_mode = #tpu.pipeline_mode<synchronous>, transform_indices = @transform_3, window_bounds = array<i64: 14, 28>}, {pipeline_mode = #tpu.pipeline_mode<synchronous>, transform_indices = @transform_4, window_bounds = array<i64: 168, 84>}, {pipeline_mode = #tpu.pipeline_mode<synchronous>, transform_indices = @transform_5, window_bounds = array<i64: 5, 84, 160>}, {pipeline_mode = #tpu.pipeline_mode<synchronous>, transform_indices = @transform_6, window_bounds = array<i64: 1, 160>}, {pipeline_mode = #tpu.pipeline_mode<synchronous>, transform_indices = @transform_7, window_bounds = array<i64: 5, 10>}, {pipeline_mode = #tpu.pipeline_mode<synchronous>, transform_indices = @transform_8, window_bounds = array<i64: 160, 80>}, {pipeline_mode = #tpu.pipeline_mode<synchronous>, transform_indices = @transform_9, window_bounds = array<i64: 5, 80, 128>}, {pipeline_mode = #tpu.pipeline_mode<synchronous>, transform_indices = @transform_10, window_bounds = array<i64: 1, 128>}, {pipeline_mode = #tpu.pipeline_mode<synchronous>, transform_indices = @transform_11, window_bounds = array<i64: 128, 128>}, {pipeline_mode = #tpu.pipeline_mode<synchronous>, transform_indices = @transform_12, window_bounds = array<i64: 1, 128>}, {pipeline_mode = #tpu.pipeline_mode<synchronous>, transform_indices = @transform_13, window_bounds = array<i64: 128, 128>}, {pipeline_mode = #tpu.pipeline_mode<synchronous>, transform_indices = @transform_14, window_bounds = array<i64: 1, 128>}, {transform_indices = @transform_15, window_bounds = array<i64: 1, 1, 128>}]} {
    %c0 = arith.constant 0 : index
    %c0_0 = arith.constant 0 : index
    %c0_1 = arith.constant 0 : index
    %0 = vector.load %arg1[%c0, %c0_0, %c0_1] : memref<1x32x32xf32, #tpu.memory_space<vmem>>, vector<1x32x32xf32>
    %1 = vector.shape_cast %0 : vector<1x32x32xf32> to vector<32x32xf32>
    %cst = arith.constant 0.000000e+00 : f32
    %2 = vector.broadcast %cst : f32 to vector<28x168xf32>
    %3 = vector.extract_strided_slice %1 {offsets = [0, 0], sizes = [28, 32], strides = [1, 1]} : vector<32x32xf32> to vector<28x32xf32>
    %c0_2 = arith.constant 0 : index
    %c0_3 = arith.constant 0 : index
    %c0_4 = arith.constant 0 : index
    %4 = vector.load %arg2[%c0_2, %c0_3, %c0_4] : memref<5x32x168xf32, #tpu.memory_space<vmem>>, vector<1x32x168xf32>
    %5 = vector.shape_cast %4 : vector<1x32x168xf32> to vector<32x168xf32>
    %cst_5 = arith.constant dense<0.000000e+00> : vector<28x168xf32>
    %6 = tpu.matmul %3, %5, %cst_5 {dimension_numbers = #tpu.dot_dimension_numbers<[1], [0], [0], [1], [0, 0, 1, 1], [], []>} : vector<28x32xf32>, vector<32x168xf32>, vector<28x168xf32> -> vector<28x168xf32>
    %7 = arith.addf %2, %6 : vector<28x168xf32>
    %8 = vector.extract_strided_slice %1 {offsets = [1, 0], sizes = [28, 32], strides = [1, 1]} : vector<32x32xf32> to vector<28x32xf32>
    %c1 = arith.constant 1 : index
    %c0_6 = arith.constant 0 : index
    %c0_7 = arith.constant 0 : index
    %9 = vector.load %arg2[%c1, %c0_6, %c0_7] : memref<5x32x168xf32, #tpu.memory_space<vmem>>, vector<1x32x168xf32>
    %10 = vector.shape_cast %9 : vector<1x32x168xf32> to vector<32x168xf32>
    %cst_8 = arith.constant dense<0.000000e+00> : vector<28x168xf32>
    %11 = tpu.matmul %8, %10, %cst_8 {dimension_numbers = #tpu.dot_dimension_numbers<[1], [0], [0], [1], [0, 0, 1, 1], [], []>} : vector<28x32xf32>, vector<32x168xf32>, vector<28x168xf32> -> vector<28x168xf32>
    %12 = arith.addf %7, %11 : vector<28x168xf32>
    %13 = vector.extract_strided_slice %1 {offsets = [2, 0], sizes = [28, 32], strides = [1, 1]} : vector<32x32xf32> to vector<28x32xf32>
    %c2 = arith.constant 2 : index
    %c0_9 = arith.constant 0 : index
    %c0_10 = arith.constant 0 : index
    %14 = vector.load %arg2[%c2, %c0_9, %c0_10] : memref<5x32x168xf32, #tpu.memory_space<vmem>>, vector<1x32x168xf32>
    %15 = vector.shape_cast %14 : vector<1x32x168xf32> to vector<32x168xf32>
    %cst_11 = arith.constant dense<0.000000e+00> : vector<28x168xf32>
    %16 = tpu.matmul %13, %15, %cst_11 {dimension_numbers = #tpu.dot_dimension_numbers<[1], [0], [0], [1], [0, 0, 1, 1], [], []>} : vector<28x32xf32>, vector<32x168xf32>, vector<28x168xf32> -> vector<28x168xf32>
    %17 = arith.addf %12, %16 : vector<28x168xf32>
    %18 = vector.extract_strided_slice %1 {offsets = [3, 0], sizes = [28, 32], strides = [1, 1]} : vector<32x32xf32> to vector<28x32xf32>
    %c3 = arith.constant 3 : index
    %c0_12 = arith.constant 0 : index
    %c0_13 = arith.constant 0 : index
    %19 = vector.load %arg2[%c3, %c0_12, %c0_13] : memref<5x32x168xf32, #tpu.memory_space<vmem>>, vector<1x32x168xf32>
    %20 = vector.shape_cast %19 : vector<1x32x168xf32> to vector<32x168xf32>
    %cst_14 = arith.constant dense<0.000000e+00> : vector<28x168xf32>
    %21 = tpu.matmul %18, %20, %cst_14 {dimension_numbers = #tpu.dot_dimension_numbers<[1], [0], [0], [1], [0, 0, 1, 1], [], []>} : vector<28x32xf32>, vector<32x168xf32>, vector<28x168xf32> -> vector<28x168xf32>
    %22 = arith.addf %17, %21 : vector<28x168xf32>
    %23 = vector.extract_strided_slice %1 {offsets = [4, 0], sizes = [28, 32], strides = [1, 1]} : vector<32x32xf32> to vector<28x32xf32>
    %c4 = arith.constant 4 : index
    %c0_15 = arith.constant 0 : index
    %c0_16 = arith.constant 0 : index
    %24 = vector.load %arg2[%c4, %c0_15, %c0_16] : memref<5x32x168xf32, #tpu.memory_space<vmem>>, vector<1x32x168xf32>
    %25 = vector.shape_cast %24 : vector<1x32x168xf32> to vector<32x168xf32>
    %cst_17 = arith.constant dense<0.000000e+00> : vector<28x168xf32>
    %26 = tpu.matmul %23, %25, %cst_17 {dimension_numbers = #tpu.dot_dimension_numbers<[1], [0], [0], [1], [0, 0, 1, 1], [], []>} : vector<28x32xf32>, vector<32x168xf32>, vector<28x168xf32> -> vector<28x168xf32>
    %27 = arith.addf %22, %26 : vector<28x168xf32>
    %c0_18 = arith.constant 0 : index
    %c0_19 = arith.constant 0 : index
    %28 = vector.load %arg3[%c0_18, %c0_19] : memref<1x168xf32, #tpu.memory_space<vmem>>, vector<1x168xf32>
    %29 = vector.broadcast %28 : vector<1x168xf32> to vector<28x168xf32>
    %30 = arith.addf %27, %29 : vector<28x168xf32>
    %cst_20 = arith.constant 0.000000e+00 : f32
    %31 = vector.broadcast %cst_20 : f32 to vector<28x168xf32>
    %32 = arith.maximumf %30, %31 : vector<28x168xf32>
    %c0_21 = arith.constant 0 : index
    %c0_22 = arith.constant 0 : index
    %33 = vector.load %arg4[%c0_21, %c0_22] : memref<14x28xf32, #tpu.memory_space<vmem>>, vector<14x28xf32>
    %cst_23 = arith.constant dense<0.000000e+00> : vector<14x168xf32>
    %34 = tpu.matmul %33, %32, %cst_23 {dimension_numbers = #tpu.dot_dimension_numbers<[1], [0], [0], [1], [0, 0, 1, 1], [], []>} : vector<14x28xf32>, vector<28x168xf32>, vector<14x168xf32> -> vector<14x168xf32>
    %c0_24 = arith.constant 0 : index
    %c0_25 = arith.constant 0 : index
    %35 = vector.load %arg5[%c0_24, %c0_25] : memref<168x84xf32, #tpu.memory_space<vmem>>, vector<168x84xf32>
    %cst_26 = arith.constant dense<0.000000e+00> : vector<14x84xf32>
    %36 = tpu.matmul %34, %35, %cst_26 {dimension_numbers = #tpu.dot_dimension_numbers<[1], [0], [0], [1], [0, 0, 1, 1], [], []>} : vector<14x168xf32>, vector<168x84xf32>, vector<14x84xf32> -> vector<14x84xf32>
    %cst_27 = arith.constant 0.000000e+00 : f32
    %37 = vector.broadcast %cst_27 : f32 to vector<10x160xf32>
    %38 = vector.extract_strided_slice %36 {offsets = [0, 0], sizes = [10, 84], strides = [1, 1]} : vector<14x84xf32> to vector<10x84xf32>
    %c0_28 = arith.constant 0 : index
    %c0_29 = arith.constant 0 : index
    %c0_30 = arith.constant 0 : index
    %39 = vector.load %arg6[%c0_28, %c0_29, %c0_30] : memref<5x84x160xf32, #tpu.memory_space<vmem>>, vector<1x84x160xf32>
    %40 = vector.shape_cast %39 : vector<1x84x160xf32> to vector<84x160xf32>
    %cst_31 = arith.constant dense<0.000000e+00> : vector<10x160xf32>
    %41 = tpu.matmul %38, %40, %cst_31 {dimension_numbers = #tpu.dot_dimension_numbers<[1], [0], [0], [1], [0, 0, 1, 1], [], []>} : vector<10x84xf32>, vector<84x160xf32>, vector<10x160xf32> -> vector<10x160xf32>
    %42 = arith.addf %37, %41 : vector<10x160xf32>
    %43 = vector.extract_strided_slice %36 {offsets = [1, 0], sizes = [10, 84], strides = [1, 1]} : vector<14x84xf32> to vector<10x84xf32>
    %c1_32 = arith.constant 1 : index
    %c0_33 = arith.constant 0 : index
    %c0_34 = arith.constant 0 : index
    %44 = vector.load %arg6[%c1_32, %c0_33, %c0_34] : memref<5x84x160xf32, #tpu.memory_space<vmem>>, vector<1x84x160xf32>
    %45 = vector.shape_cast %44 : vector<1x84x160xf32> to vector<84x160xf32>
    %cst_35 = arith.constant dense<0.000000e+00> : vector<10x160xf32>
    %46 = tpu.matmul %43, %45, %cst_35 {dimension_numbers = #tpu.dot_dimension_numbers<[1], [0], [0], [1], [0, 0, 1, 1], [], []>} : vector<10x84xf32>, vector<84x160xf32>, vector<10x160xf32> -> vector<10x160xf32>
    %47 = arith.addf %42, %46 : vector<10x160xf32>
    %48 = vector.extract_strided_slice %36 {offsets = [2, 0], sizes = [10, 84], strides = [1, 1]} : vector<14x84xf32> to vector<10x84xf32>
    %c2_36 = arith.constant 2 : index
    %c0_37 = arith.constant 0 : index
    %c0_38 = arith.constant 0 : index
    %49 = vector.load %arg6[%c2_36, %c0_37, %c0_38] : memref<5x84x160xf32, #tpu.memory_space<vmem>>, vector<1x84x160xf32>
    %50 = vector.shape_cast %49 : vector<1x84x160xf32> to vector<84x160xf32>
    %cst_39 = arith.constant dense<0.000000e+00> : vector<10x160xf32>
    %51 = tpu.matmul %48, %50, %cst_39 {dimension_numbers = #tpu.dot_dimension_numbers<[1], [0], [0], [1], [0, 0, 1, 1], [], []>} : vector<10x84xf32>, vector<84x160xf32>, vector<10x160xf32> -> vector<10x160xf32>
    %52 = arith.addf %47, %51 : vector<10x160xf32>
    %53 = vector.extract_strided_slice %36 {offsets = [3, 0], sizes = [10, 84], strides = [1, 1]} : vector<14x84xf32> to vector<10x84xf32>
    %c3_40 = arith.constant 3 : index
    %c0_41 = arith.constant 0 : index
    %c0_42 = arith.constant 0 : index
    %54 = vector.load %arg6[%c3_40, %c0_41, %c0_42] : memref<5x84x160xf32, #tpu.memory_space<vmem>>, vector<1x84x160xf32>
    %55 = vector.shape_cast %54 : vector<1x84x160xf32> to vector<84x160xf32>
    %cst_43 = arith.constant dense<0.000000e+00> : vector<10x160xf32>
    %56 = tpu.matmul %53, %55, %cst_43 {dimension_numbers = #tpu.dot_dimension_numbers<[1], [0], [0], [1], [0, 0, 1, 1], [], []>} : vector<10x84xf32>, vector<84x160xf32>, vector<10x160xf32> -> vector<10x160xf32>
    %57 = arith.addf %52, %56 : vector<10x160xf32>
    %58 = vector.extract_strided_slice %36 {offsets = [4, 0], sizes = [10, 84], strides = [1, 1]} : vector<14x84xf32> to vector<10x84xf32>
    %c4_44 = arith.constant 4 : index
    %c0_45 = arith.constant 0 : index
    %c0_46 = arith.constant 0 : index
    %59 = vector.load %arg6[%c4_44, %c0_45, %c0_46] : memref<5x84x160xf32, #tpu.memory_space<vmem>>, vector<1x84x160xf32>
    %60 = vector.shape_cast %59 : vector<1x84x160xf32> to vector<84x160xf32>
    %cst_47 = arith.constant dense<0.000000e+00> : vector<10x160xf32>
    %61 = tpu.matmul %58, %60, %cst_47 {dimension_numbers = #tpu.dot_dimension_numbers<[1], [0], [0], [1], [0, 0, 1, 1], [], []>} : vector<10x84xf32>, vector<84x160xf32>, vector<10x160xf32> -> vector<10x160xf32>
    %62 = arith.addf %57, %61 : vector<10x160xf32>
    %c0_48 = arith.constant 0 : index
    %c0_49 = arith.constant 0 : index
    %63 = vector.load %arg7[%c0_48, %c0_49] : memref<1x160xf32, #tpu.memory_space<vmem>>, vector<1x160xf32>
    %64 = vector.broadcast %63 : vector<1x160xf32> to vector<10x160xf32>
    %65 = arith.addf %62, %64 : vector<10x160xf32>
    %cst_50 = arith.constant 0.000000e+00 : f32
    %66 = vector.broadcast %cst_50 : f32 to vector<10x160xf32>
    %67 = arith.maximumf %65, %66 : vector<10x160xf32>
    %c0_51 = arith.constant 0 : index
    %c0_52 = arith.constant 0 : index
    %68 = vector.load %arg8[%c0_51, %c0_52] : memref<5x10xf32, #tpu.memory_space<vmem>>, vector<5x10xf32>
    %cst_53 = arith.constant dense<0.000000e+00> : vector<5x160xf32>
    %69 = tpu.matmul %68, %67, %cst_53 {dimension_numbers = #tpu.dot_dimension_numbers<[1], [0], [0], [1], [0, 0, 1, 1], [], []>} : vector<5x10xf32>, vector<10x160xf32>, vector<5x160xf32> -> vector<5x160xf32>
    %c0_54 = arith.constant 0 : index
    %c0_55 = arith.constant 0 : index
    %70 = vector.load %arg9[%c0_54, %c0_55] : memref<160x80xf32, #tpu.memory_space<vmem>>, vector<160x80xf32>
    %cst_56 = arith.constant dense<0.000000e+00> : vector<5x80xf32>
    %71 = tpu.matmul %69, %70, %cst_56 {dimension_numbers = #tpu.dot_dimension_numbers<[1], [0], [0], [1], [0, 0, 1, 1], [], []>} : vector<5x160xf32>, vector<160x80xf32>, vector<5x80xf32> -> vector<5x80xf32>
    %c0_57 = arith.constant 0 : index
    %c0_58 = arith.constant 0 : index
    %72 = vector.load %arg11[%c0_57, %c0_58] : memref<1x128xf32, #tpu.memory_space<vmem>>, vector<1x128xf32>
    %73 = vector.extract_strided_slice %71 {offsets = [0, 0], sizes = [1, 80], strides = [1, 1]} : vector<5x80xf32> to vector<1x80xf32>
    %c0_59 = arith.constant 0 : index
    %c0_60 = arith.constant 0 : index
    %c0_61 = arith.constant 0 : index
    %74 = vector.load %arg10[%c0_59, %c0_60, %c0_61] : memref<5x80x128xf32, #tpu.memory_space<vmem>>, vector<1x80x128xf32>
    %75 = vector.shape_cast %74 : vector<1x80x128xf32> to vector<80x128xf32>
    %cst_62 = arith.constant dense<0.000000e+00> : vector<1x128xf32>
    %76 = tpu.matmul %73, %75, %cst_62 {dimension_numbers = #tpu.dot_dimension_numbers<[1], [0], [0], [1], [0, 0, 1, 1], [], []>} : vector<1x80xf32>, vector<80x128xf32>, vector<1x128xf32> -> vector<1x128xf32>
    %77 = arith.addf %72, %76 : vector<1x128xf32>
    %78 = vector.extract_strided_slice %71 {offsets = [1, 0], sizes = [1, 80], strides = [1, 1]} : vector<5x80xf32> to vector<1x80xf32>
    %c1_63 = arith.constant 1 : index
    %c0_64 = arith.constant 0 : index
    %c0_65 = arith.constant 0 : index
    %79 = vector.load %arg10[%c1_63, %c0_64, %c0_65] : memref<5x80x128xf32, #tpu.memory_space<vmem>>, vector<1x80x128xf32>
    %80 = vector.shape_cast %79 : vector<1x80x128xf32> to vector<80x128xf32>
    %cst_66 = arith.constant dense<0.000000e+00> : vector<1x128xf32>
    %81 = tpu.matmul %78, %80, %cst_66 {dimension_numbers = #tpu.dot_dimension_numbers<[1], [0], [0], [1], [0, 0, 1, 1], [], []>} : vector<1x80xf32>, vector<80x128xf32>, vector<1x128xf32> -> vector<1x128xf32>
    %82 = arith.addf %77, %81 : vector<1x128xf32>
    %83 = vector.extract_strided_slice %71 {offsets = [2, 0], sizes = [1, 80], strides = [1, 1]} : vector<5x80xf32> to vector<1x80xf32>
    %c2_67 = arith.constant 2 : index
    %c0_68 = arith.constant 0 : index
    %c0_69 = arith.constant 0 : index
    %84 = vector.load %arg10[%c2_67, %c0_68, %c0_69] : memref<5x80x128xf32, #tpu.memory_space<vmem>>, vector<1x80x128xf32>
    %85 = vector.shape_cast %84 : vector<1x80x128xf32> to vector<80x128xf32>
    %cst_70 = arith.constant dense<0.000000e+00> : vector<1x128xf32>
    %86 = tpu.matmul %83, %85, %cst_70 {dimension_numbers = #tpu.dot_dimension_numbers<[1], [0], [0], [1], [0, 0, 1, 1], [], []>} : vector<1x80xf32>, vector<80x128xf32>, vector<1x128xf32> -> vector<1x128xf32>
    %87 = arith.addf %82, %86 : vector<1x128xf32>
    %88 = vector.extract_strided_slice %71 {offsets = [3, 0], sizes = [1, 80], strides = [1, 1]} : vector<5x80xf32> to vector<1x80xf32>
    %c3_71 = arith.constant 3 : index
    %c0_72 = arith.constant 0 : index
    %c0_73 = arith.constant 0 : index
    %89 = vector.load %arg10[%c3_71, %c0_72, %c0_73] : memref<5x80x128xf32, #tpu.memory_space<vmem>>, vector<1x80x128xf32>
    %90 = vector.shape_cast %89 : vector<1x80x128xf32> to vector<80x128xf32>
    %cst_74 = arith.constant dense<0.000000e+00> : vector<1x128xf32>
    %91 = tpu.matmul %88, %90, %cst_74 {dimension_numbers = #tpu.dot_dimension_numbers<[1], [0], [0], [1], [0, 0, 1, 1], [], []>} : vector<1x80xf32>, vector<80x128xf32>, vector<1x128xf32> -> vector<1x128xf32>
    %92 = arith.addf %87, %91 : vector<1x128xf32>
    %93 = vector.extract_strided_slice %71 {offsets = [4, 0], sizes = [1, 80], strides = [1, 1]} : vector<5x80xf32> to vector<1x80xf32>
    %c4_75 = arith.constant 4 : index
    %c0_76 = arith.constant 0 : index
    %c0_77 = arith.constant 0 : index
    %94 = vector.load %arg10[%c4_75, %c0_76, %c0_77] : memref<5x80x128xf32, #tpu.memory_space<vmem>>, vector<1x80x128xf32>
    %95 = vector.shape_cast %94 : vector<1x80x128xf32> to vector<80x128xf32>
    %cst_78 = arith.constant dense<0.000000e+00> : vector<1x128xf32>
    %96 = tpu.matmul %93, %95, %cst_78 {dimension_numbers = #tpu.dot_dimension_numbers<[1], [0], [0], [1], [0, 0, 1, 1], [], []>} : vector<1x80xf32>, vector<80x128xf32>, vector<1x128xf32> -> vector<1x128xf32>
    %97 = arith.addf %92, %96 : vector<1x128xf32>
    %cst_79 = arith.constant 0.000000e+00 : f32
    %98 = vector.broadcast %cst_79 : f32 to vector<1x128xf32>
    %99 = arith.maximumf %97, %98 : vector<1x128xf32>
    %c0_80 = arith.constant 0 : index
    %c0_81 = arith.constant 0 : index
    %100 = vector.load %arg12[%c0_80, %c0_81] : memref<128x128xf32, #tpu.memory_space<vmem>>, vector<128x128xf32>
    %cst_82 = arith.constant dense<0.000000e+00> : vector<1x128xf32>
    %101 = tpu.matmul %99, %100, %cst_82 {dimension_numbers = #tpu.dot_dimension_numbers<[1], [0], [0], [1], [0, 0, 1, 1], [], []>} : vector<1x128xf32>, vector<128x128xf32>, vector<1x128xf32> -> vector<1x128xf32>
    %c0_83 = arith.constant 0 : index
    %c0_84 = arith.constant 0 : index
    %102 = vector.load %arg13[%c0_83, %c0_84] : memref<1x128xf32, #tpu.memory_space<vmem>>, vector<1x128xf32>
    %103 = arith.addf %101, %102 : vector<1x128xf32>
    %cst_85 = arith.constant 0.000000e+00 : f32
    %104 = vector.broadcast %cst_85 : f32 to vector<1x128xf32>
    %105 = arith.maximumf %103, %104 : vector<1x128xf32>
    %c0_86 = arith.constant 0 : index
    %c0_87 = arith.constant 0 : index
    %106 = vector.load %arg14[%c0_86, %c0_87] : memref<128x128xf32, #tpu.memory_space<vmem>>, vector<128x128xf32>
    %cst_88 = arith.constant dense<0.000000e+00> : vector<1x128xf32>
    %107 = tpu.matmul %105, %106, %cst_88 {dimension_numbers = #tpu.dot_dimension_numbers<[1], [0], [0], [1], [0, 0, 1, 1], [], []>} : vector<1x128xf32>, vector<128x128xf32>, vector<1x128xf32> -> vector<1x128xf32>
    %c0_89 = arith.constant 0 : index
    %c0_90 = arith.constant 0 : index
    %108 = vector.load %arg15[%c0_89, %c0_90] : memref<1x128xf32, #tpu.memory_space<vmem>>, vector<1x128xf32>
    %109 = arith.addf %107, %108 : vector<1x128xf32>
    %c0_91 = arith.constant 0 : index
    %c0_92 = arith.constant 0 : index
    %c0_93 = arith.constant 0 : index
    %110 = vector.load %arg16[%c0_91, %c0_92, %c0_93] : memref<1x1x128xf32, #tpu.memory_space<vmem>>, vector<1x1x128xf32>
    %111 = vector.shape_cast %110 : vector<1x1x128xf32> to vector<1x128xf32>
    %112 = vector.shape_cast %109 : vector<1x128xf32> to vector<1x1x128xf32>
    tpu.vector_store %arg16[%c0_91, %c0_92, %c0_93], %112 {strides = array<i32>} : memref<1x1x128xf32, #tpu.memory_space<vmem>>, vector<1x1x128xf32>,
    return
  }
  func.func @transform_0(%arg0: i32) -> (i32, i32, i32) {
    %c0_i32 = arith.constant 0 : i32
    %c0_i32_0 = arith.constant 0 : i32
    %c0_i32_1 = arith.constant 0 : i32
    return %arg0, %c0_i32, %c0_i32_0 : i32, i32, i32
  }
  func.func @transform_1(%arg0: i32) -> (i32, i32, i32) {
    %c0_i32 = arith.constant 0 : i32
    %c0_i32_0 = arith.constant 0 : i32
    %c0_i32_1 = arith.constant 0 : i32
    %c0_i32_2 = arith.constant 0 : i32
    return %c0_i32, %c0_i32_0, %c0_i32_1 : i32, i32, i32
  }
  func.func @transform_2(%arg0: i32) -> (i32, i32) {
    %c0_i32 = arith.constant 0 : i32
    %c0_i32_0 = arith.constant 0 : i32
    %c0_i32_1 = arith.constant 0 : i32
    return %c0_i32, %c0_i32_0 : i32, i32
  }
  func.func @transform_3(%arg0: i32) -> (i32, i32) {
    %c0_i32 = arith.constant 0 : i32
    %c0_i32_0 = arith.constant 0 : i32
    %c0_i32_1 = arith.constant 0 : i32
    return %c0_i32, %c0_i32_0 : i32, i32
  }
  func.func @transform_4(%arg0: i32) -> (i32, i32) {
    %c0_i32 = arith.constant 0 : i32
    %c0_i32_0 = arith.constant 0 : i32
    %c0_i32_1 = arith.constant 0 : i32
    return %c0_i32, %c0_i32_0 : i32, i32
  }
  func.func @transform_5(%arg0: i32) -> (i32, i32, i32) {
    %c0_i32 = arith.constant 0 : i32
    %c0_i32_0 = arith.constant 0 : i32
    %c0_i32_1 = arith.constant 0 : i32
    %c0_i32_2 = arith.constant 0 : i32
    return %c0_i32, %c0_i32_0, %c0_i32_1 : i32, i32, i32
  }
  func.func @transform_6(%arg0: i32) -> (i32, i32) {
    %c0_i32 = arith.constant 0 : i32
    %c0_i32_0 = arith.constant 0 : i32
    %c0_i32_1 = arith.constant 0 : i32
    return %c0_i32, %c0_i32_0 : i32, i32
  }
  func.func @transform_7(%arg0: i32) -> (i32, i32) {
    %c0_i32 = arith.constant 0 : i32
    %c0_i32_0 = arith.constant 0 : i32
    %c0_i32_1 = arith.constant 0 : i32
    return %c0_i32, %c0_i32_0 : i32, i32
  }
  func.func @transform_8(%arg0: i32) -> (i32, i32) {
    %c0_i32 = arith.constant 0 : i32
    %c0_i32_0 = arith.constant 0 : i32
    %c0_i32_1 = arith.constant 0 : i32
    return %c0_i32, %c0_i32_0 : i32, i32
  }
  func.func @transform_9(%arg0: i32) -> (i32, i32, i32) {
    %c0_i32 = arith.constant 0 : i32
    %c0_i32_0 = arith.constant 0 : i32
    %c0_i32_1 = arith.constant 0 : i32
    %c0_i32_2 = arith.constant 0 : i32
    return %c0_i32, %c0_i32_0, %c0_i32_1 : i32, i32, i32
  }
  func.func @transform_10(%arg0: i32) -> (i32, i32) {
    %c0_i32 = arith.constant 0 : i32
    %c0_i32_0 = arith.constant 0 : i32
    %c0_i32_1 = arith.constant 0 : i32
    return %c0_i32, %c0_i32_0 : i32, i32
  }
  func.func @transform_11(%arg0: i32) -> (i32, i32) {
    %c0_i32 = arith.constant 0 : i32
    %c0_i32_0 = arith.constant 0 : i32
    %c0_i32_1 = arith.constant 0 : i32
    return %c0_i32, %c0_i32_0 : i32, i32
  }
  func.func @transform_12(%arg0: i32) -> (i32, i32) {
    %c0_i32 = arith.constant 0 : i32
    %c0_i32_0 = arith.constant 0 : i32
    %c0_i32_1 = arith.constant 0 : i32
    return %c0_i32, %c0_i32_0 : i32, i32
  }
  func.func @transform_13(%arg0: i32) -> (i32, i32) {
    %c0_i32 = arith.constant 0 : i32
    %c0_i32_0 = arith.constant 0 : i32
    %c0_i32_1 = arith.constant 0 : i32
    return %c0_i32, %c0_i32_0 : i32, i32
  }
  func.func @transform_14(%arg0: i32) -> (i32, i32) {
    %c0_i32 = arith.constant 0 : i32
    %c0_i32_0 = arith.constant 0 : i32
    %c0_i32_1 = arith.constant 0 : i32
    return %c0_i32, %c0_i32_0 : i32, i32
  }
  func.func @transform_15(%arg0: i32) -> (i32, i32, i32) {
    %c0_i32 = arith.constant 0 : i32
    %c0_i32_0 = arith.constant 0 : i32
    %c0_i32_1 = arith.constant 0 : i32
    return %arg0, %c0_i32, %c0_i32_0 : i32, i32, i32
  }
}

</mosaic_0001>

<bundles_post_ra>
// kernel: _lambda_.1
= control target key start
LH: loop header
LB: loop body
LE: loop exit
PB: predicated region body
PF: predicated region fallthrough
CT: control target
= control target key end

     0   :  { %s4476_s0 = inlined_call_operand.hbm [shape: f32[2,32,32], index: 0, kind: input, shape index: {}]   ;;  %s4477_s1 = inlined_call_operand.hbm [shape: f32[5,32,168], index: 1, kind: input, shape index: {}]   ;;  %s4478_s2 = inlined_call_operand.vmem [shape: f32[1,168], index: 2, kind: input, shape index: {}]   ;;  %s4479_s3 = inlined_call_operand.hbm [shape: f32[14,28], index: 3, kind: input, shape index: {}]   ;;  %s4480_s4 = inlined_call_operand.hbm [shape: f32[168,84], index: 4, kind: input, shape index: {}]   ;;  %s4481_s5 = inlined_call_operand.hbm [shape: f32[5,84,160], index: 5, kind: input, shape index: {}]   ;;  %s4482_s6 = inlined_call_operand.vmem [shape: f32[1,160], index: 6, kind: input, shape index: {}]   ;;  %s4483_s7 = inlined_call_operand.vmem [shape: f32[5,10], index: 7, kind: input, shape index: {}]   ;;  %s4484_s8 = inlined_call_operand.hbm [shape: f32[160,80], index: 8, kind: input, shape index: {}]   ;;  %s4485_s9 = inlined_call_operand.hbm [shape: f32[5,80,128], index: 9, kind: input, shape index: {}]   ;;  %s4486_s10 = inlined_call_operand.vmem [shape: f32[1,128], index: 10, kind: input, shape index: {}]   ;;  %s4487_s11 = inlined_call_operand.hbm [shape: f32[128,128], index: 11, kind: input, shape index: {}]   ;;  %s4488_s12 = inlined_call_operand.vmem [shape: f32[1,128], index: 12, kind: input, shape index: {}]   ;;  %s4489_s13 = inlined_call_operand.hbm [shape: f32[128,128], index: 13, kind: input, shape index: {}]   ;;  %s4490_s14 = inlined_call_operand.vmem [shape: f32[1,128], index: 14, kind: input, shape index: {}]   ;;  %s4491_s15 = inlined_call_operand.hbm [shape: f32[2,1,128], index: 15, kind: output, shape index: {}]  }
   0x1   :  { %4501 = sst [smem:[#allocation24_spill]] %s4477_s1 }
   0x2   :  { %4502 = sst [smem:[#allocation25_spill]] %s4479_s3 }
   0x3   :  { %4503 = sst [smem:[#allocation26_spill]] %s4480_s4 }
   0x4   :  { %4504 = sst [smem:[#allocation27_spill]] %s4481_s5 }
   0x5   :  { %4505 = sst [smem:[#allocation28_spill]] %s4484_s8 }
   0x6   :  { %4506 = sst [smem:[#allocation29_spill]] %s4485_s9 }
   0x7   :  { %4507 = sst [smem:[#allocation30_spill]] %s4488_s12 }
   0x8   :  { %4508 = sst [smem:[#allocation31_spill]] %s4490_s14 }
   0x9   :  { %4509 = sst [smem:[#allocation32_spill]] %s4491_s15 }
   0xa   :  { %20 = vsyncpa [#allocation3], 0 }
   0xb   :  { %22 = vsyncpa [#allocation3 + $0x1], 0 }
   0xc   :  { %23 = vsyncpa [#allocation6], 0 }
   0xd   :  { %24 = vsyncpa [#allocation9], 0 }
   0xe   :  { %25 = vsyncpa [#allocation12], 0 }
   0xf   :  { %26 = vsyncpa [#allocation15], 0 }
  0x10   :  { %27 = vsyncpa [#allocation4], 0 }
  0x11   :  { %29 = vsyncpa [#allocation4 + $0x1], 0  ;;  %s3879_s18 = smov 0   ;;  %s3881_s19 = smov 0  }
  0x12   :  { %s3883_s20 = smov 0   ;;  %s3885_s21 = smov 0  }
  0x13 LB: > { %s3783_s22 = smov [#allocation5]   ;;  %s3900_s24 = sadd.s32 4294967295, %s3781_s21   ;;  %s3781_s21 = sphi %s3885_s21, %s4547_s21   ;;  %s3777_s20 = sphi %s3883_s20, %s4546_s20   ;;  %s3773_s19 = sphi %s3881_s19, %s4545_s19   ;;  %s3769_s18 = sphi %s3879_s18, %s4544_s18  }
  0x14   : > { %s398_s23 = sshll.u32 %s3783_s22, 4  ;;  %p2976_p0 = scmp.ge.s32.totalorder %s3781_s21, 1  ;;  %s399_s23 = int_to_ptr.vmem [resolvable:$true] %s398_s23 }
  0x15   : > { %p4497_p1 = scmp.eq.s32.totalorder %s3900_s24, 0  ;;  %p386_p2 = scmp.lt.s32.totalorder %s3781_s21, 3 }
  0x16   : > { %s3784_s27 = smov [#allocation8]   ;;  %s3785_s29 = smov [#allocation11]  }
  0x17   : > { %p3905_p3 = pnand %p2976_p0, %p386_p2  ;;  %s427_s28 = sshll.u32 %s3784_s27, 4  ;;  %s3918_s28 = int_to_ptr.vmem [resolvable:$true] %s427_s28 }
  0x18   : > { %s3920_s30 = sshll.u32 %s3785_s29, 4  ;;  %s3476_s17 = scalar_lea.vmem %s399_s23, 5120  ;;  %s460_s30 = int_to_ptr.vmem [resolvable:$true] %s3920_s30 }
  0x19   : > { %s4510_s25 = scalar_select %p3905_p3, 1, 0 }
  0x1a   : > { %p3368_p5 = pneg %p3905_p3  ;;  %p3477_p8 = scmp.ne.s32.totalorder %s399_s23, %s3476_s17 }
  0x1b   : > { %p3484_p11 = scmp.lt.s32.totalorder %s399_s23, %s399_s23  ;;  %p3485_p12 = scmp.lt.s32.totalorder %s3476_s17, %s3476_s17 }
  0x1c   : > { %p3914_p6 = pnand %p3368_p5, %p4497_p1 }
  0x1d   : > { %p3486_p13 = por %p3485_p12, %p3484_p11 }
  0x1e   : > { %p3924_p7 = pneg %p3914_p6 }
  0x20   : > { %p3479_p9 = pnand %p3477_p8, %p3924_p7 }
  0x22   : > { %p3480_p10 = pneg %p3479_p9 }
  0x24   : > { %p3487_p0 = pnand %p3486_p13, %p3480_p10 }
  0x26   : > { %3490 = shalt.err (!%p3487_p0)
}
  0x27   : > { %s4493_s22 = smov 256   ;;  %s4494_s27 = smov 16  }
  0x28   : > { %s4513_s1 = sld [smem:[#allocation24_spill]]  ;;  %s3502_s14 = scalar_lea.vmem %s3918_s28, 2688 }
  0x29   : > { %p3503_p2 = scmp.ne.s32.totalorder %s3918_s28, %s3502_s14  ;;  %p3510_p9 = scmp.lt.s32.totalorder %s3918_s28, %s3918_s28 }
  0x2a   : > { %p3511_p10 = scmp.lt.s32.totalorder %s3502_s14, %s3502_s14 }
  0x2b   : > { %p3505_p5 = pnand %p3503_p2, %p3924_p7 }
  0x2c   : > { %p3512_p11 = por %p3511_p10, %p3510_p9 }
  0x2d   : > { %p3506_p8 = pneg %p3505_p5 }
  0x2e   : > { %3371 = dma.hbm_to_vmem [thread:$0]  (!%p3914_p6), %s4513_s1, 5120, %s399_s23, [#allocation6], %s4493_s22, %s4493_s22, %s4494_s27  }
  0x2f   : > { %p3513_p12 = pnand %p3512_p11, %p3506_p8 }
  0x31   : > { %3516 = shalt.err (!%p3513_p12)
}
  0x32   : > { %s4495_s17 = smov 128   ;;  %s4496_s12 = smov 8  }
  0x33   : > { %s4514_s4 = sld [smem:[#allocation26_spill]]  ;;  %s3528_s29 = scalar_lea.vmem %s460_s30, 2560 }
  0x34   : > { %p3529_p13 = scmp.ne.s32.totalorder %s460_s30, %s3528_s29  ;;  %p3536_p5 = scmp.lt.s32.totalorder %s460_s30, %s460_s30 }
  0x35   : > { %p3537_p8 = scmp.lt.s32.totalorder %s3528_s29, %s3528_s29 }
  0x36   : > { %p3531_p0 = pnand %p3529_p13, %p3924_p7 }
  0x37   : > { %p3538_p9 = por %p3537_p8, %p3536_p5 }
  0x38   : > { %p3532_p2 = pneg %p3531_p0 }
  0x39   : > { %3377 = dma.hbm_to_vmem [thread:$0]  (!%p3914_p6), %s4514_s4, 2688, %s3918_s28, [#allocation9], %s4495_s17, %s4495_s17, %s4496_s12  }
  0x3a   : > { %p3539_p10 = pnand %p3538_p9, %p3532_p2 }
  0x3c   : > { %3542 = shalt.err (!%p3539_p10)
}
  0x3d   : > { %s4515_s8 = sld [smem:[#allocation28_spill]]  ;;  %s3790_s28 = smov [#allocation14]  }
  0x3e   : > { %s488_s15 = sshll.u32 %s3790_s28, 4  ;;  %s3791_s23 = smov [#allocation7]   ;;  %s489_s15 = int_to_ptr.vmem [resolvable:$true] %s488_s15 }
  0x3f   : > { %s414_s27 = sshll.u32 %s3791_s23, 4  ;;  %s3554_s1 = scalar_lea.vmem %s489_s15, 2048  ;;  %s415_s27 = int_to_ptr.vmem [resolvable:$true] %s414_s27 }
  0x40   : > { %p3555_p11 = scmp.ne.s32.totalorder %s489_s15, %s3554_s1  ;;  %p3562_p0 = scmp.lt.s32.totalorder %s489_s15, %s489_s15 }
  0x41   : > { %p3563_p2 = scmp.lt.s32.totalorder %s3554_s1, %s3554_s1 }
  0x42   : > { %p3557_p12 = pnand %p3555_p11, %p3924_p7 }
  0x43   : > { %3383 = dma.hbm_to_vmem [thread:$0]  (!%p3914_p6), %s4515_s8, 2560, %s460_s30, [#allocation12], %s4495_s17, %s4495_s17, %s4496_s12  }
  0x44   : > { %p3558_p13 = pneg %p3557_p12  ;;  %p3564_p5 = por %p3563_p2, %p3562_p0 }
  0x46   : > { %p3565_p8 = pnand %p3564_p5, %p3558_p13 }
  0x48   : > { %3568 = shalt.err (!%p3565_p8)
}
  0x49   : > { %3389 = dma.hbm_to_vmem [thread:$0]  (!%p3914_p6), %s4487_s11, 2048, %s489_s15, [#allocation15], %s4495_s17, %s4495_s17, %s4496_s12  }
  0x4a   : > { %s3580_s29 = scalar_lea.vmem %s415_s27, 256  ;;  %p3588_p12 = scmp.lt.s32.totalorder %s415_s27, %s415_s27 }
  0x4b   : > { %p3581_p9 = scmp.ne.s32.totalorder %s415_s27, %s3580_s29  ;;  %p3589_p0 = scmp.lt.s32.totalorder %s3580_s29, %s3580_s29 }
  0x4d   : > { %p3583_p10 = pnand %p3581_p9, %p3924_p7  ;;  %p3590_p13 = por %p3589_p0, %p3588_p12 }
  0x4f   : > { %p3584_p11 = pneg %p3583_p10 }
  0x51   : > { %p3591_p2 = pnand %p3590_p13, %p3584_p11 }
  0x53   : > { %3594 = shalt.err (!%p3591_p2)
}
  0x54   : > { %s4516_s3 = sld [smem:[#allocation25_spill]]  ;;  %s3792_s28 = smov [#allocation10]  }
  0x55   : > { %s440_s15 = sshll.u32 %s3792_s28, 4  ;;  %s3793_s23 = smov [#allocation13]   ;;  %s441_s15 = int_to_ptr.vmem [resolvable:$true] %s440_s15 }
  0x56   : > { %s472_s30 = sshll.u32 %s3793_s23, 4  ;;  %s3606_s22 = scalar_lea.vmem %s441_s15, 14080  ;;  %s473_s30 = int_to_ptr.vmem [resolvable:$true] %s472_s30 }
  0x57   : > { %p3607_p5 = scmp.ne.s32.totalorder %s441_s15, %s3606_s22  ;;  %p3614_p10 = scmp.lt.s32.totalorder %s441_s15, %s441_s15 }
  0x58   : > { %p3615_p11 = scmp.lt.s32.totalorder %s3606_s22, %s3606_s22 }
  0x59   : > { %p3609_p8 = pnand %p3607_p5, %p3924_p7 }
  0x5a   : > { %3374 = dma.hbm_to_vmem [thread:$0]  (!%p3914_p6), %s4516_s3, 256, %s415_s27, [#allocation6], %s4495_s17, %s4495_s17, %s4496_s12  }
  0x5b   : > { %p3610_p9 = pneg %p3609_p8  ;;  %p3616_p12 = por %p3615_p11, %p3614_p10 }
  0x5d   : > { %p3617_p0 = pnand %p3616_p12, %p3610_p9 }
  0x5f   : > { %3620 = shalt.err (!%p3617_p0)
}
  0x60   : > { %s4517_s29 = smov 16   ;;  %s4518_s1 = smov 256  }
  0x61   : > { %s4519_s5 = sld [smem:[#allocation27_spill]]  ;;  %s3632_s28 = scalar_lea.vmem %s473_s30, 6400 }
  0x62   : > { %p3633_p13 = scmp.ne.s32.totalorder %s473_s30, %s3632_s28  ;;  %p3640_p8 = scmp.lt.s32.totalorder %s473_s30, %s473_s30 }
  0x63   : > { %p3641_p10 = scmp.lt.s32.totalorder %s3632_s28, %s3632_s28 }
  0x64   : > { %p3635_p2 = pnand %p3633_p13, %p3924_p7 }
  0x65   : > { %p3642_p9 = por %p3641_p10, %p3640_p8 }
  0x66   : > { %p3636_p5 = pneg %p3635_p2 }
  0x67   : > { %3380 = dma.hbm_to_vmem [thread:$0]  (!%p3914_p6), %s4519_s5, 14080, %s441_s15, [#allocation9], %s4518_s1, %s4518_s1, %s4517_s29  }
  0x68   : > { %p3643_p11 = pnand %p3642_p9, %p3636_p5 }
  0x6a   : > { %3646 = shalt.err (!%p3643_p11)
}
  0x6b   : > { %s4520_s9 = sld [smem:[#allocation29_spill]]  ;;  %s3794_s15 = smov [#allocation16]  }
  0x6c   : > { %s504_s29 = sshll.u32 %s3794_s15, 4  ;;  %s505_s29 = int_to_ptr.vmem [resolvable:$true] %s504_s29 }
  0x6d   : > { %s3658_s1 = scalar_lea.vmem %s505_s29, 2048  ;;  %p3666_p2 = scmp.lt.s32.totalorder %s505_s29, %s505_s29 }
  0x6e   : > { %p3659_p12 = scmp.ne.s32.totalorder %s505_s29, %s3658_s1  ;;  %p3667_p5 = scmp.lt.s32.totalorder %s3658_s1, %s3658_s1 }
  0x70   : > { %p3661_p0 = pnand %p3659_p12, %p3924_p7  ;;  %p3668_p8 = por %p3667_p5, %p3666_p2 }
  0x71   : > { %3386 = dma.hbm_to_vmem [thread:$0]  (!%p3914_p6), %s4520_s9, 6400, %s473_s30, [#allocation12], %s4495_s17, %s4495_s17, %s4496_s12  }
  0x72   : > { %p3662_p13 = pneg %p3661_p0 }
  0x74   : > { %p3669_p10 = pnand %p3668_p8, %p3662_p13 }
  0x76   : > { %3672 = shalt.err (!%p3669_p10)
}
  0x77   : > { %3392 = dma.hbm_to_vmem [thread:$0]  (!%p3914_p6), %s4489_s13, 2048, %s505_s29, [#allocation15], %s4495_s17, %s4495_s17, %s4496_s12  }
  0x78   : > { %s2975_s26 = sadd.s32 4294967294, %s3781_s21   ;;  %s4016_s16 = sadd.s32 1, %s3781_s21  }
  0x79   : > { %s39_s14 = ssub.s32 %s3781_s21, %s4016_s16  ;;  %s42_s28 = sadd.s32 1, %s3777_s20 }
  0x7a   : > { %p40_p7 = scmp.eq.s32.totalorder %s39_s14, 0  ;;  %p49_p9 = scmp.ne.s32.totalorder %s3777_s20, %s3773_s19 }
  0x7b   : > { %p50_p11 = scmp.eq.s32.totalorder %s3781_s21, 0  ;;  %p55_p12 = scmp.ne.s32.totalorder %s3773_s19, %s3769_s18 }
  0x7c   : > { %s4027_s23 = scalar_select %p40_p7, %s3777_s20, %s42_s28  }
  0x7d   : > { %p4029_p0 = por %p50_p11, %p49_p9  ;;  %p4035_p6 = por %p4497_p1, %p55_p12 }
  0x7e   : > { %p373_p13 = scmp.eq.s32.totalorder %s3900_s24, 1  ;;  %p379_p2 = scmp.eq.s32.totalorder %s2975_s26, 1 }
  0x7f   : > { %s4522_s15 = scalar_select %p4035_p6, 1, 0 }
  0x80   : > { %p3409_p5 = scmp.lt.s32.totalorder %s3781_s21, 2  ;;  %s521_s29 = sand.u32 1, %s3777_s20  }
  0x81   : > { %p4042_p8 = por %p373_p13, %p49_p9  ;;  %p4046_p10 = por %p379_p2, %p55_p12 }
  0x82   : > { %s2986_s30 = sshll.u32 %s521_s29, 5  ;;  %s3057_s14 = sshll.u32 %s3781_s21, 9 }
  0x83   : > { %s4523_s1 = scalar_select %p4042_p8, 1, 0 }
  0x84   : > { %s4524_s27 = scalar_select %p4046_p10, 1, 0 }
  0x85   : > { %s4054_s12 = scalar_lea.hbm %s4476_s0, %s3057_s14  ;;  %s525_s26 = scalar_lea.vmem [#allocation2], %s2986_s30 }
  0x86   : > { %s532_s3 = sshll.u32 %s525_s26, 4  ;;  %p4060_p7 = pnand %p3409_p5, %p4029_p0  ;;  %s4056_s3 = int_to_ptr.vmem [resolvable:$true] %s532_s3 }
  0x87   : > { %s4064_s5 = scalar_lea.sflag [#allocation3], %s521_s29  ;;  %s3673_s8 = scalar_lea.hbm %s4054_s12, 512 }
  0x88   : > { %p3674_p9 = scmp.ne.s32.totalorder %s4054_s12, %s3673_s8  ;;  %p3675_p11 = pneg %p4060_p7 }
  0x89   : > { %s3678_s30 = scalar_lea.hbm %s4476_s0, 1024  ;;  %p3679_p0 = scmp.lt.s32.totalorder %s4054_s12, %s4476_s0 }
  0x8a   : > { %p3676_p12 = pnand %p3675_p11, %p3674_p9  ;;  %p3680_p2 = scmp.lt.s32.totalorder %s3678_s30, %s3673_s8 }
  0x8c   : > { %p3677_p13 = pneg %p3676_p12  ;;  %p3681_p5 = por %p3680_p2, %p3679_p0 }
  0x8e   : > { %p3682_p4 = pnand %p3681_p5, %p3677_p13 }
  0x90   : > { %3685 = shalt.err (!%p3682_p4)
}
  0x91   : > { %s3686_s22 = scalar_lea.vmem %s4056_s3, 512  ;;  %s3795_s29 = smov [#allocation2]  }
  0x92   : > { %p3687_p1 = scmp.ne.s32.totalorder %s4056_s3, %s3686_s22  ;;  %s3691_s9 = sshll.u32 %s3795_s29, 4  ;;  %s3692_s9 = int_to_ptr.vmem [resolvable:$false] %s3691_s9 }
  0x93   : > { %s3693_s17 = scalar_lea.vmem %s3692_s9, 1024  ;;  %p3694_p12 = scmp.lt.s32.totalorder %s4056_s3, %s3692_s9 }
  0x94   : > { %p3689_p10 = pnand %p3687_p1, %p3675_p11  ;;  %p3695_p8 = scmp.lt.s32.totalorder %s3693_s17, %s3686_s22 }
  0x96   : > { %p3690_p9 = pneg %p3689_p10  ;;  %p3696_p6 = por %p3695_p8, %p3694_p12 }
  0x98   : > { %p3697_p3 = pnand %p3696_p6, %p3690_p9 }
  0x9a   : > { %3700 = shalt.err (!%p3697_p3)
}
  0x9b   : > { %s4526_s8 = smov 8   ;;  %s4527_s14 = smov 128  }
  0x9c   : > { %3396 = dma.hbm_to_vmem [thread:$0]  (!%p4060_p7), %s4054_s12, 512, %s4056_s3, %s4064_s5, %s4527_s14, %s4527_s14, %s4526_s8  }
  0x9d   : > { %p4528_p1 = scmp.ne.s32.totalorder %s4510_s25, 0 }
  0x9e   : > { %s4091_s30 = sand.u32 (!%p4528_p1), 1, %s3773_s19   ;;  %p4529_p3 = scmp.ne.s32.totalorder (!%p4528_p1), %s4522_s15, 0 }
  0x9f   : > { %544 = sbr.rel (%p4528_p1) target bundleno = 2128 (0x850), region = 80  ;;  %s2990_s9 = sshll.u32 (!%p4528_p1), %s4091_s30, 5 }
  0xa0   : > { %s547_s28 = scalar_lea.sflag (!%p4528_p1), [#allocation3], %s4091_s30  ;;  %s4095_s26 = scalar_lea.vmem (!%p4528_p1), [#allocation2], %s2990_s9 }
  0xa4   : > { %3744 = dma.done.wait (%p4529_p3), %s547_s28, 512  }
  0xa5   : > { %3746 = vsyncadd (%p4529_p3), %s547_s28, 4294966784  ;;  %p4530_p4 = scmp.eq.s32.totalorder %s3900_s24, 0 }
  0xa7   : > { %3748 = dma.done.wait (%p4530_p4), [#allocation6], 5376   ;;  %p4531_p6 = pmov %p4530_p4 }
  0xa8   : > { %p4532_p8 = pmov %p4530_p4 }
  0xa9   : > { %3750 = vsyncadd (%p4531_p6), [#allocation6], 4294961920 }
  0xaa   : > { %3752 = dma.done.wait (%p4532_p8), [#allocation9], 16768   ;;  %p4533_p10 = pmov %p4530_p4 }
  0xab   : > { %p4534_p7 = pmov %p4530_p4 }
  0xac   : > { %3754 = vsyncadd (%p4533_p10), [#allocation9], 4294950528 }
  0xad   : > { %3756 = dma.done.wait (%p4534_p7), [#allocation12], 8960   ;;  %p4535_p11 = pmov %p4530_p4 }
  0xae   : > { %p4536_p13 = pmov %p4530_p4 }
  0xaf   : > { %3758 = vsyncadd (%p4535_p11), [#allocation12], 4294958336 }
  0xb0   : > { %3760 = dma.done.wait (%p4536_p13), [#allocation15], 4096   ;;  %p4537_p0 = pmov %p4530_p4 }
  0xb1   : > { %v3796_v0 = vmov 0.0   ;;  %v648_v1 = vld [vmem:[#allocation5 + $0x78] sm:$0xff]  ;;  %v647_v3 = vld [vmem:[#allocation5 + $0x70] sm:$0xff]  ;;  %v646_v5 = vld [vmem:[#allocation5 + $0x68] sm:$0xff]  ;;  %vm653_vm0 = vcmask 1046528   ;;  %vm661_vm1 = vcmask 261120  }
  0xb2   : > { %3762 = vsyncadd (%p4537_p0), [#allocation15], 4294963200  ;;  %734 = vmatprep.mubr.f32.mxu0 %v3796_v0  ;;  %831 = vmatprep.mubr.f32.mxu1 %v3796_v0  ;;  %v639_v2 = vld [vmem:[#allocation5 + $0x38] sm:$0xff]  ;;  %v638_v4 = vld [vmem:[#allocation5 + $0x30] sm:$0xff]  ;;  %vm865_vm2 = vcmask 1045504   ;;  %vm987_vm3 = vcmask 1044480  }
  0xb3   : > { %694 = vmatprep.subr.mxu0 %v648_v1  ;;  %791 = vmatprep.subr.mxu1 %v639_v2  ;;  %v637_v6 = vld [vmem:[#allocation5 + $0x28] sm:$0xff]  ;;  %v645_v7 = vld [vmem:[#allocation5 + $0x60] sm:$0xff]  ;;  %v644_v9 = vld [vmem:[#allocation5 + $0x58] sm:$0xff]  ;;  %vm1109_vm4 = vcmask 1043456   ;;  %vm1252_vm5 = vcmask 228352   ;;  %vm1363_vm6 = vcmask 326656  }
  0xb4   : > { %695 = vmatpush1.msra.mxu0 %v647_v3  ;;  %792 = vmatpush1.msra.mxu1 %v638_v4  ;;  %v636_v8 = vld [vmem:[#allocation5 + $0x20] sm:$0xff]  ;;  %v635_v10 = vld [vmem:[#allocation5 + $0x18] sm:$0xff]  ;;  %v643_v11 = vld [vmem:[#allocation5 + $0x50] sm:$0xff]  ;;  %vm1495_vm7 = vcmask 687104   ;;  %vm2046_vm8 = vcmask 1041408   ;;  %vm2042_vm9 = vcmask 80896  }
  0xb5   : > { %696 = vmatprep.subr.mxu0 %v646_v5  ;;  %793 = vmatprep.subr.mxu1 %v637_v6  ;;  %v634_v12 = vld [vmem:[#allocation5 + $0x10] sm:$0xff]  ;;  %v642_v13 = vld [vmem:[#allocation5 + $0x48] sm:$0xff]  ;;  %v641_v15 = vld [vmem:[#allocation5 + $0x40] sm:$0xff]  ;;  %vm3797_vm10 = vmmov 0   ;;  %vm2228_vm11 = vcmask 654336   ;;  %s4538_s14 = sld [smem:[#allocation30_spill]] }
  0xb6   : > { %697 = vmatpush1.msra.mxu0 %v645_v7  ;;  %794 = vmatpush1.msra.mxu1 %v636_v8  ;;  %v633_v14 = vld [vmem:[#allocation5 + $0x8] sm:$0xff]  ;;  %v632_v16 = vld [vmem:[#allocation5] sm:$0xff]  ;;  %v4128_v21 = vld [vmem:[%s4095_s26 + $0x10] sm:$0xff]  ;;  %s3054_s3 = sshll.u32 %s3900_s24, 4  ;;  %s627_s4 = scalar_lea.vmem [#allocation17], %s4091_s30 }
  0xb7   : > { %698 = vmatprep.subr.mxu0 %v644_v9  ;;  %795 = vmatprep.subr.mxu1 %v635_v10  ;;  %v4120_v17 = vld [vmem:[%s4095_s26] sm:$0xff]  ;;  %v4123_v18 = vld [vmem:[%s4095_s26 + $0x8] sm:$0xff]  ;;  %v657_v22 = vrot.slane %v4128_v21, 1  ;;  %v4132_v23 = vld [vmem:[%s4095_s26 + $0x18] sm:$0xff]  ;;  %v869_v50 = vrot.slane %v4128_v21, 2  ;;  %v991_v51 = vrot.slane %v4128_v21, 3 }
  0xb8   : > { %699 = vmatpush1.msra.mxu0 %v643_v11  ;;  %796 = vmatpush1.msra.mxu1 %v634_v12  ;;  %v654_v19 = vrot.slane %v4120_v17, 1  ;;  %v655_v20 = vrot.slane %v4123_v18, 1  ;;  %v864_v25 = vld [vmem:[#allocation5 + $0xb8] sm:$0xff]  ;;  %v863_v27 = vld [vmem:[#allocation5 + $0xb0] sm:$0xff]  ;;  %v659_v30 = vrot.slane %v4132_v23, 1  ;;  %v862_v31 = vld [vmem:[#allocation5 + $0xa8] sm:$0xff] }
  0xb9   : > { %700 = vmatprep.subr.mxu0 %v642_v13  ;;  %797 = vmatprep.subr.mxu1 %v633_v14  ;;  %v986_v26 = vld [vmem:[#allocation5 + $0xf8] sm:$0xff]  ;;  %v985_v28 = vld [vmem:[#allocation5 + $0xf0] sm:$0xff]  ;;  %v984_v32 = vld [vmem:[#allocation5 + $0xe8] sm:$0xff]  ;;  %v866_v40 = vrot.slane %v4120_v17, 2  ;;  %v867_v41 = vrot.slane %v4123_v18, 2  ;;  %v988_v42 = vrot.slane %v4120_v17, 3 }
  0xba   : > { %701 = vmatpush1.msra.mxu0 %v641_v15  ;;  %798 = vmatpush1.msra.mxu1 %v632_v16  ;;  %v656_v24 = vsel %vm653_vm0, %v654_v19, %v655_v20  ;;  %v658_v29 = vsel %vm653_vm0, %v655_v20, %v657_v22  ;;  %v861_v33 = vld [vmem:[#allocation5 + $0xa0] sm:$0xff]  ;;  %v660_v35 = vsel %vm653_vm0, %v657_v22, %v659_v30  ;;  %v860_v36 = vld [vmem:[#allocation5 + $0x98] sm:$0xff]  ;;  %v859_v38 = vld [vmem:[#allocation5 + $0x90] sm:$0xff]  ;;  %v989_v43 = vrot.slane %v4123_v18, 3  ;;  %s4539_s26 = sld [smem:[#allocation31_spill]]  ;;  %s2833_s5 = sshll.u32 %s627_s4, 4  ;;  %s2834_s5 = int_to_ptr.vmem [resolvable:$true] %s2833_s5 }
  0xbb   : > { %2999 = vmatmul.mubr.msk.f32.vlgmr.msra.gmra.mxu0 %vm661_vm1, %v656_v24  ;;  %3003 = vmatmul.mubr.msk.f32.vlgmr.msra.gmra.mxu1 %vm661_vm1, %v4120_v17  ;;  %v983_v34 = vld [vmem:[#allocation5 + $0xe0] sm:$0xff]  ;;  %v982_v37 = vld [vmem:[#allocation5 + $0xd8] sm:$0xff]  ;;  %v981_v39 = vld [vmem:[#allocation5 + $0xd0] sm:$0xff]  ;;  %v868_v48 = vsel %vm865_vm2, %v866_v40, %v867_v41  ;;  %v870_v54 = vsel %vm865_vm2, %v867_v41, %v869_v50  ;;  %v871_v56 = vrot.slane %v4132_v23, 2  ;;  %v993_v57 = vrot.slane %v4132_v23, 3  ;;  %s4540_s15 = sld [smem:[#allocation32_spill]] }
  0xbc   : > { %740 = vmatprep.mubr.f32.mxu0 %v3796_v0  ;;  %837 = vmatprep.mubr.f32.mxu1 %v3796_v0  ;;  %v858_v44 = vld [vmem:[#allocation5 + $0x88] sm:$0xff]  ;;  %v857_v45 = vld [vmem:[#allocation5 + $0x80] sm:$0xff]  ;;  %v990_v49 = vsel %vm987_vm3, %v988_v42, %v989_v43  ;;  %v1108_v52 = vld [vmem:[#allocation5 + $0x138] sm:$0xff]  ;;  %v992_v55 = vsel %vm987_vm3, %v989_v43, %v991_v51  ;;  %v1110_v2 = vrot.slane %v4120_v17, 4  ;;  %v1111_v3 = vrot.slane %v4123_v18, 4  ;;  %s2821_s29 = scalar_lea.sflag [#allocation4], %s4091_s30 }
  0xbd   : > { %905 = vmatprep.subr.mxu0 %v864_v25  ;;  %1027 = vmatprep.subr.mxu1 %v986_v26  ;;  %v980_v46 = vld [vmem:[#allocation5 + $0xc8] sm:$0xff]  ;;  %v979_v47 = vld [vmem:[#allocation5 + $0xc0] sm:$0xff]  ;;  %v1107_v53 = vld [vmem:[#allocation5 + $0x130] sm:$0xff]  ;;  %v872_v60 = vsel %vm865_vm2, %v869_v50, %v871_v56  ;;  %v994_v61 = vsel %vm987_vm3, %v991_v51, %v993_v57  ;;  %v1113_v6 = vrot.slane %v4128_v21, 4  ;;  %v1115_v8 = vrot.slane %v4132_v23, 4  ;;  %s3701_s17 = scalar_lea.vmem %s2834_s5, 16 }
  0xbe   : > { %906 = vmatpush1.msra.mxu0 %v863_v27  ;;  %1028 = vmatpush1.msra.mxu1 %v985_v28  ;;  %v1106_v58 = vld [vmem:[#allocation5 + $0x128] sm:$0xff]  ;;  %v1105_v59 = vld [vmem:[#allocation5 + $0x120] sm:$0xff]  ;;  %v1104_v62 = vld [vmem:[#allocation5 + $0x118] sm:$0xff]  ;;  %v1112_v5 = vsel %vm1109_vm4, %v1110_v2, %v1111_v3  ;;  %p3702_p2 = scmp.ne.s32.totalorder %s2834_s5, %s3701_s17  ;;  %p4541_p5 = scmp.ne.s32.totalorder %s4523_s1, 0 }
  0xbf   : > { %3000 = vmatmul.mubr.msk.f32.gmra.mxu0 %vm661_vm1, %v658_v29  ;;  %3004 = vmatmul.mubr.msk.f32.gmra.mxu1 %vm661_vm1, %v4123_v18  ;;  %v1103_v63 = vld [vmem:[#allocation5 + $0x110] sm:$0xff]  ;;  %v1102_v1 = vld [vmem:[#allocation5 + $0x108] sm:$0xff]  ;;  %v1101_v4 = vld [vmem:[#allocation5 + $0x100] sm:$0xff]  ;;  %v1114_v7 = vsel %vm1109_vm4, %v1111_v3, %v1113_v6  ;;  %v1116_v9 = vsel %vm1109_vm4, %v1113_v6, %v1115_v8  ;;  %s3798_s8 = smov [#allocation17]  }
  0xc0   : > { %746 = vmatprep.mubr.f32.mxu0 %v3796_v0  ;;  %843 = vmatprep.mubr.f32.mxu1 %v3796_v0  ;;  %v1357_v10 = vld [vmem:[#allocation8 + $0x78] sm:$0xff]  ;;  %v1356_v11 = vld [vmem:[#allocation8 + $0x70] sm:$0xff]  ;;  %v1355_v12 = vld [vmem:[#allocation8 + $0x68] sm:$0xff]  ;;  %p3703_p9 = pnand %p3702_p2, %p4541_p5  ;;  %s3705_s24 = sshll.u32 %s3798_s8, 4  ;;  %s3706_s24 = int_to_ptr.vmem [resolvable:$false] %s3705_s24 }
  0xc1   : > { %907 = vmatprep.subr.mxu0 %v862_v31  ;;  %1029 = vmatprep.subr.mxu1 %v984_v32  ;;  %v1354_v13 = vld [vmem:[#allocation8 + $0x60] sm:$0xff]  ;;  %v1353_v14 = vld [vmem:[#allocation8 + $0x58] sm:$0xff]  ;;  %v1352_v15 = vld [vmem:[#allocation8 + $0x50] sm:$0xff]  ;;  %s4439_s22 = scalar_lea.hbm %s4540_s15, %s3054_s3  ;;  %p3708_p1 = scmp.lt.s32.totalorder %s2834_s5, %s3706_s24 }
  0xc2   : > { %908 = vmatpush1.msra.mxu0 %v861_v33  ;;  %1030 = vmatpush1.msra.mxu1 %v983_v34  ;;  %v1351_v16 = vld [vmem:[#allocation8 + $0x48] sm:$0xff]  ;;  %v1350_v17 = vld [vmem:[#allocation8 + $0x40] sm:$0xff]  ;;  %v1349_v18 = vld [vmem:[#allocation8 + $0x38] sm:$0xff]  ;;  %p3704_p12 = pneg %p3703_p9 }
  0xc3   : > { %3001 = vmatmul.mubr.msk.f32.gmra.mxu0 %vm661_vm1, %v660_v35  ;;  %3005 = vmatmul.mubr.msk.f32.gmra.mxu1 %vm661_vm1, %v4128_v21  ;;  %v1348_v19 = vld [vmem:[#allocation8 + $0x30] sm:$0xff]  ;;  %v1347_v20 = vld [vmem:[#allocation8 + $0x28] sm:$0xff]  ;;  %v1346_v21 = vld [vmem:[#allocation8 + $0x20] sm:$0xff] }
  0xc4   : > { %752 = vmatprep.mubr.f32.mxu0 %v3796_v0  ;;  %849 = vmatprep.mubr.f32.mxu1 %v3796_v0  ;;  %v1345_v22 = vld [vmem:[#allocation8 + $0x18] sm:$0xff]  ;;  %v1343_v24 = vld [vmem:[#allocation8 + $0x8] sm:$0xff]  ;;  %v1342_v25 = vld [vmem:[#allocation8] sm:$0xff] }
  0xc5   : > { %909 = vmatprep.subr.mxu0 %v860_v36  ;;  %1031 = vmatprep.subr.mxu1 %v982_v37  ;;  %v1362_v26 = vld [vmem:[#allocation8 + $0xa0] sm:$0xff]  ;;  %v1361_v27 = vld [vmem:[#allocation8 + $0x98] sm:$0xff]  ;;  %v1360_v28 = vld [vmem:[#allocation8 + $0x90] sm:$0xff] }
  0xc6   : > { %910 = vmatpush1.msra.mxu0 %v859_v38  ;;  %1032 = vmatpush1.msra.mxu1 %v981_v39 }
  0xc7   : > { %3002 = vmatmul.mubr.msk.f32.gmra.mxu0 %vm661_vm1, %v659_v30  ;;  %3006 = vmatmul.mubr.msk.f32.gmra.mxu1 %vm661_vm1, %v4132_v23  ;;  %v1344_v23 = vld [vmem:[#allocation8 + $0x10] sm:$0xff] }
  0xc8   : > { %911 = vmatprep.subr.mxu0 %v858_v44  ;;  %945 = vmatprep.mubr.f32.mxu0 %v3796_v0 }
  0xc9   : > { %912 = vmatpush1.msra.mxu0 %v857_v45  ;;  %1033 = vmatprep.subr.mxu1 %v980_v46 }
  0xca   : > { %1034 = vmatpush1.msra.mxu1 %v979_v47  ;;  %1067 = vmatprep.mubr.f32.mxu1 %v3796_v0 }
  0xcb   : > { %3007 = vmatmul.mubr.msk.f32.vlgmr.msra.gmra.mxu0 %vm661_vm1, %v868_v48  ;;  %3011 = vmatmul.mubr.msk.f32.vlgmr.msra.gmra.mxu1 %vm661_vm1, %v990_v49 }
  0xcc   : > { %951 = vmatprep.mubr.f32.mxu0 %v3796_v0  ;;  %1073 = vmatprep.mubr.f32.mxu1 %v3796_v0 }
  0xcd   : > { %1149 = vmatprep.subr.mxu0 %v1108_v52 }
  0xce   : > { %1150 = vmatpush1.msra.mxu0 %v1107_v53 }
  0xcf   : > { %3008 = vmatmul.mubr.msk.f32.gmra.mxu0 %vm661_vm1, %v870_v54  ;;  %3012 = vmatmul.mubr.msk.f32.gmra.mxu1 %vm661_vm1, %v992_v55 }
  0xd0   : > { %957 = vmatprep.mubr.f32.mxu0 %v3796_v0  ;;  %1079 = vmatprep.mubr.f32.mxu1 %v3796_v0 }
  0xd1   : > { %1151 = vmatprep.subr.mxu0 %v1106_v58 }
  0xd2   : > { %1152 = vmatpush1.msra.mxu0 %v1105_v59 }
  0xd3   : > { %3009 = vmatmul.mubr.msk.f32.gmra.mxu0 %vm661_vm1, %v872_v60  ;;  %3013 = vmatmul.mubr.msk.f32.gmra.mxu1 %vm661_vm1, %v994_v61  ;;  %v1224_v60 = vlaneseq }
  0xd4   : > { %963 = vmatprep.mubr.f32.mxu0 %v3796_v0  ;;  %1153 = vmatprep.subr.mxu0 %v1104_v62 }
  0xd5   : > { %1085 = vmatprep.mubr.f32.mxu1 %v3796_v0  ;;  %1154 = vmatpush1.msra.mxu0 %v1103_v63 }
  0xd6   : > { %1155 = vmatprep.subr.mxu0 %v1102_v1 }
  0xd7   : > { %3010 = vmatmul.mubr.msk.f32.gmra.mxu0 %vm661_vm1, %v871_v56  ;;  %3014 = vmatmul.mubr.msk.f32.gmra.mxu1 %vm661_vm1, %v993_v57 }
  0xd8   : > { %1156 = vmatpush1.msra.mxu0 %v1101_v4  ;;  %1189 = vmatprep.mubr.f32.mxu0 %v3796_v0  ;;  %v4222_v4 = vshrl.u32 %v1224_v60, 7 }
  0xd9   : > { %1329 = vmatprep.mubr.f32.mxu1 %v3796_v0  ;;  %1370 = vmatprep.subr.mxu0 %v3796_v0 }
  0xdb   : > { %3015 = vmatmul.mubr.msk.f32.vlgmr.msra.gmra.mxu0 %vm661_vm1, %v1112_v5 }
  0xdc   : > { %1195 = vmatprep.mubr.f32.mxu0 %v3796_v0  ;;  %1371 = vmatpush1.msra.mxu0 %v1357_v10 }
  0xdd   : > { %1372 = vmatprep.subr.mxu0 %v3796_v0 }
  0xde   : > { %1373 = vmatpush1.msra.mxu0 %v1356_v11 }
  0xdf   : > { %3016 = vmatmul.mubr.msk.f32.gmra.mxu0 %vm661_vm1, %v1114_v7  ;;  %1374 = vmatprep.subr.mxu0 %v3796_v0 }
  0xe0   : > { %1201 = vmatprep.mubr.f32.mxu0 %v3796_v0  ;;  %1375 = vmatpush1.msra.mxu0 %v1355_v12 }
  0xe1   : > { %1376 = vmatprep.subr.mxu0 %v3796_v0 }
  0xe2   : > { %1377 = vmatpush1.msra.mxu0 %v1354_v13 }
  0xe3   : > { %3017 = vmatmul.mubr.msk.f32.gmra.mxu0 %vm661_vm1, %v1116_v9  ;;  %1378 = vmatprep.subr.mxu0 %v3796_v0 }
  0xe4   : > { %1207 = vmatprep.mubr.f32.mxu0 %v3796_v0  ;;  %1379 = vmatpush1.msra.mxu0 %v1353_v14 }
  0xe5   : > { %1380 = vmatprep.subr.mxu0 %v3796_v0 }
  0xe6   : > { %1381 = vmatpush1.msra.mxu0 %v1352_v15 }
  0xe7   : > { %3018 = vmatmul.mubr.msk.f32.gmra.mxu0 %vm661_vm1, %v1115_v8  ;;  %1382 = vmatprep.subr.mxu0 %v3796_v0 }
  0xe8   : > { %1383 = vmatpush1.msra.mxu0 %v1351_v16 }
  0xe9   : > { %1384 = vmatprep.subr.mxu0 %v3796_v0 }
  0xea   : > { %1385 = vmatpush1.msra.mxu0 %v1350_v17 }
  0xeb   : > { %1386 = vmatprep.subr.mxu0 %v3796_v0 }
  0xec   : > { %1387 = vmatpush1.msra.mxu0 %v1349_v18 }
  0xed   : > { %1388 = vmatprep.subr.mxu0 %v3796_v0 }
  0xee   : > { %1389 = vmatpush1.msra.mxu0 %v1348_v19  ;;  %v1226_v19 = vsub.s32 0, %v4222_v4 }
  0xef   : > { %1390 = vmatprep.subr.mxu0 %v3796_v0 }
  0xf0   : > { %1391 = vmatpush1.msra.mxu0 %v1347_v20 }
  0xf1   : > { %1392 = vmatprep.subr.mxu0 %v3796_v0 }
  0xf2   : > { %1393 = vmatpush1.msra.mxu0 %v1346_v21 }
  0xf3   : > { %1394 = vmatprep.subr.mxu0 %v3796_v0 }
  0xf4   : > { %1395 = vmatpush1.msra.mxu0 %v1345_v22 }
  0xf5   : > { %1396 = vmatprep.subr.mxu0 %v3796_v0 }
  0xf6   : > { %1397 = vmatpush1.msra.mxu0 %v1344_v23 }
  0xf7   : > { %1398 = vmatprep.subr.mxu0 %v3796_v0 }
  0xf8   : > { %1399 = vmatpush1.msra.mxu0 %v1343_v24  ;;  %v1222_v24 = vld [vmem:[%s4478_s2] sm:$0x3] }
  0xf9   : > { %1400 = vmatprep.subr.mxu0 %v3796_v0 }
  0xfa   : > { %1401 = vmatpush1.msra.mxu0 %v1342_v25  ;;  %v1230_v25 = vsub.s32 1, %v4222_v4  ;;  %v2139_v4 = vld [vmem:[#allocation11 + $0x78] sm:$0xff] }
  0xfb   : > { %1424 = vmatprep.subr.mxu0 %v3796_v0 }
  0xfc   : > { %1425 = vmatpush2.msra.mxu0 %v1362_v26 }
  0xfd   : > { %1426 = vmatprep.subr.mxu0 %v3796_v0 }
  0xfe   : > { %1427 = vmatpush2.msra.mxu0 %v1361_v27 }
  0xff   : > { %1428 = vmatprep.subr.mxu0 %v3796_v0 }
 0x100   : > { %1429 = vmatpush2.msra.mxu0 %v1360_v28 }
 0x101   : > { %1430 = vmatprep.subr.mxu0 %v3796_v0 }
 0x17b   : > { %v736_v29 = vpop.f32.mrf.mxu0  ;;  %v833_v30 = vpop.f32.mrf.mxu1 }
 0x17c   : > { %v834_v16 = vadd.f32 %v833_v30, %v736_v29 }
 0x17d   : > { %v738_v31 = vpop.f32.mrf.mxu0  ;;  %v835_v32 = vpop.f32.mrf.mxu1 }
 0x17e   : > { %v836_v13 = vadd.f32 %v835_v32, %v738_v31 }
 0x17f   : > { %v742_v33 = vpop.f32.mrf.mxu0  ;;  %v839_v34 = vpop.f32.mrf.mxu1 }
 0x180   : > { %v840_v10 = vadd.f32 %v839_v34, %v742_v33  ;;  %v1227_v34 = vrot.slane %v1222_v24, %v1226_v19 }
 0x181   : > { %v744_v35 = vpop.f32.mrf.mxu0  ;;  %v841_v36 = vpop.f32.mrf.mxu1 }
 0x182   : > { %v842_v6 = vadd.f32 %v841_v36, %v744_v35 }
 0x183   : > { %v748_v37 = vpop.f32.mrf.mxu0  ;;  %v845_v38 = vpop.f32.mrf.mxu1 }
 0x184   : > { %v846_v2 = vadd.f32 %v845_v38, %v748_v37  ;;  %v1231_v38 = vrot.slane %v1222_v24, %v1230_v25 }
 0x185   : > { %v750_v39 = vpop.f32.mrf.mxu0  ;;  %v847_v40 = vpop.f32.mrf.mxu1 }
 0x186   : > { %v848_v63 = vadd.f32 %v847_v40, %v750_v39 }
 0x187   : > { %v754_v41 = vpop.f32.mrf.mxu0  ;;  %v851_v42 = vpop.f32.mrf.mxu1 }
 0x188   : > { %v852_v1 = vadd.f32 %v851_v42, %v754_v41 }
 0x189   : > { %v756_v43 = vpop.f32.mrf.mxu0  ;;  %v853_v44 = vpop.f32.mrf.mxu1 }
 0x18a   : > { %v854_v7 = vadd.f32 %v853_v44, %v756_v43 }
 0x18b   : > { %v947_v45 = vpop.f32.mrf.mxu0  ;;  %v1069_v46 = vpop.f32.mrf.mxu1 }
 0x18c   : > { %v970_v26 = vadd.f32 %v947_v45, %v834_v16  ;;  %v1477_v16 = vld [vmem:[#allocation10 + $0xf8] sm:$0xff] }
 0x18d   : > { %v949_v47 = vpop.f32.mrf.mxu0  ;;  %v1071_v48 = vpop.f32.mrf.mxu1 }
 0x18e   : > { %v971_v21 = vadd.f32 %v949_v47, %v836_v13  ;;  %v1092_v41 = vadd.f32 %v1069_v46, %v970_v26  ;;  %v1480_v13 = vld [vmem:[#allocation10 + $0x110] sm:$0xff] }
 0x18f   : > { %v953_v49 = vpop.f32.mrf.mxu0  ;;  %v1075_v51 = vpop.f32.mrf.mxu1  ;;  %v1689_v26 = vld [vmem:[#allocation10 + $0x1f0] sm:$0xff] }
 0x190   : > { %v972_v17 = vadd.f32 %v953_v49, %v840_v10  ;;  %v1093_v37 = vadd.f32 %v1071_v48, %v971_v21  ;;  %v1483_v10 = vld [vmem:[#allocation10 + $0x128] sm:$0xff] }
 0x191   : > { %v955_v50 = vpop.f32.mrf.mxu0  ;;  %v1077_v53 = vpop.f32.mrf.mxu1 }
 0x192   : > { %v973_v14 = vadd.f32 %v955_v50, %v842_v6  ;;  %v1094_v33 = vadd.f32 %v1075_v51, %v972_v17  ;;  %v1487_v6 = vld [vmem:[#allocation10 + $0x148] sm:$0xff]  ;;  %v1476_v17 = vld [vmem:[#allocation10 + $0xf0] sm:$0xff] }
 0x193   : > { %v959_v52 = vpop.f32.mrf.mxu0  ;;  %v1081_v56 = vpop.f32.mrf.mxu1 }
 0x194   : > { %v974_v11 = vadd.f32 %v959_v52, %v846_v2  ;;  %v1095_v31 = vadd.f32 %v1077_v53, %v973_v14  ;;  %v1489_v2 = vld [vmem:[#allocation10 + $0x158] sm:$0xf]  ;;  %v1479_v14 = vld [vmem:[#allocation10 + $0x108] sm:$0xff] }
 0x195   : > { %v961_v54 = vpop.f32.mrf.mxu0  ;;  %v1083_v59 = vpop.f32.mrf.mxu1 }
 0x196   : > { %v975_v8 = vadd.f32 %v961_v54, %v848_v63  ;;  %v1096_v27 = vadd.f32 %v1081_v56, %v974_v11  ;;  %v1359_v63 = vld [vmem:[#allocation8 + $0x88] sm:$0xff] }
 0x197   : > { %v965_v55 = vpop.f32.mrf.mxu0  ;;  %v1087_v3 = vpop.f32.mrf.mxu1  ;;  %1431 = vmatpush2.msra.mxu0 %v1359_v63  ;;  %v1482_v11 = vld [vmem:[#allocation10 + $0x120] sm:$0xff] }
 0x198   : > { %v976_v9 = vadd.f32 %v965_v55, %v852_v1  ;;  %v1097_v22 = vadd.f32 %v1083_v59, %v975_v8  ;;  %1432 = vmatprep.subr.mxu0 %v3796_v0  ;;  %v1358_v1 = vld [vmem:[#allocation8 + $0x80] sm:$0xff]  ;;  %v1465_v63 = vld [vmem:[#allocation10 + $0xa0] sm:$0xf] }
 0x199   : > { %v967_v57 = vpop.f32.mrf.mxu0  ;;  %v1089_v18 = vpop.f32.mrf.mxu1  ;;  %1433 = vmatpush2.msra.mxu0 %v1358_v1  ;;  %v1485_v8 = vld [vmem:[#allocation10 + $0x138] sm:$0xff]  ;;  %v1925_v1 = vld [vmem:[#allocation10 + $0x360] sm:$0xf] }
 0x19a   : > { %v977_v15 = vadd.f32 %v967_v57, %v854_v7  ;;  %v1098_v23 = vadd.f32 %v1087_v3, %v976_v9  ;;  %v1692_v3 = vld [vmem:[#allocation10 + $0x208] sm:$0xf]  ;;  %v1486_v7 = vld [vmem:[#allocation10 + $0x140] sm:$0xff]  ;;  %v1484_v9 = vld [vmem:[#allocation10 + $0x130] sm:$0xff] }
 0x19b   : > { %v1191_v58 = vpop.f32.mrf.mxu0  ;;  %3033 = vmatprep.subr.msk.mxu0 %vm1109_vm4, %v1692_v3 }
 0x19c   : > { %v1099_v32 = vadd.f32 %v1089_v18, %v977_v15  ;;  %v1214_v49 = vadd.f32 %v1191_v58, %v1092_v41  ;;  %v1478_v15 = vld [vmem:[#allocation10 + $0x100] sm:$0xff]  ;;  %v1475_v18 = vld [vmem:[#allocation10 + $0xe8] sm:$0xff]  ;;  %v1473_v41 = vld [vmem:[#allocation10 + $0xd8] sm:$0xff] }
 0x19d   : > { %v1193_v61 = vpop.f32.mrf.mxu0 }
 0x19e   : > { %v1215_v44 = vadd.f32 %v1193_v61, %v1093_v37  ;;  %v1234_v48 = vadd.f32 %v1227_v34, %v1214_v49  ;;  %v1250_v61 = vld [vmem:[#allocation7] sm:$0xff]  ;;  %v1679_v37 = vld [vmem:[#allocation10 + $0x1a0] sm:$0xff] }
 0x19f   : > { %v1197_v62 = vpop.f32.mrf.mxu0  ;;  %v1470_v49 = vld [vmem:[#allocation10 + $0xc0] sm:$0xff] }
 0x1a0   : > { %v1216_v42 = vadd.f32 %v1197_v62, %v1094_v33  ;;  %v1235_v55 = vadd.f32 %v1231_v38, %v1215_v44  ;;  %v1242_v58 = vmax.f32 %v1234_v48, 0.0  ;;  %v1251_v62 = vld [vmem:[#allocation7 + $0x8] sm:$0x3f]  ;;  %v1683_v33 = vld [vmem:[#allocation10 + $0x1c0] sm:$0xff] }
 0x1a1   : > { %v1199_v5 = vpop.f32.mrf.mxu0  ;;  %v1675_v44 = vld [vmem:[#allocation10 + $0x180] sm:$0xff] }
 0x1a2   : > { %v1217_v39 = vadd.f32 %v1199_v5, %v1095_v31  ;;  %v1236_v53 = vadd.f32 %v1227_v34, %v1216_v42  ;;  %v1243_v60 = vmax.f32 %v1235_v55, 0.0  ;;  %v1488_v5 = vld [vmem:[#allocation10 + $0x150] sm:$0xf]  ;;  %v1687_v31 = vld [vmem:[#allocation10 + $0x1e0] sm:$0xff]  ;;  %v1676_v42 = vld [vmem:[#allocation10 + $0x188] sm:$0xff] }
 0x1a3   : > { %v1203_v12 = vpop.f32.mrf.mxu0  ;;  %v1466_v55 = vld [vmem:[#allocation10 + $0xa8] sm:$0xf] }
 0x1a4   : > { %v1218_v35 = vadd.f32 %v1203_v12, %v1096_v27  ;;  %v1237_v51 = vadd.f32 %v1231_v38, %v1217_v39  ;;  %v1244_v59 = vmax.f32 %v1236_v53, 0.0  ;;  %v1481_v12 = vld [vmem:[#allocation10 + $0x118] sm:$0xff]  ;;  %v1688_v27 = vld [vmem:[#allocation10 + $0x1e8] sm:$0xff]  ;;  %v1474_v39 = vld [vmem:[#allocation10 + $0xe0] sm:$0xff] }
 0x1a5   : > { %v1205_v20 = vpop.f32.mrf.mxu0  ;;  %v1468_v53 = vld [vmem:[#allocation10 + $0xb0] sm:$0xff] }
 0x1a6   : > { %v1219_v29 = vadd.f32 %v1205_v20, %v1097_v22  ;;  %v1238_v50 = vadd.f32 %v1227_v34, %v1218_v35  ;;  %v1245_v46 = vmax.f32 %v1237_v51, 0.0  ;;  %v1691_v22 = vld [vmem:[#allocation10 + $0x200] sm:$0xf]  ;;  %v1681_v35 = vld [vmem:[#allocation10 + $0x1b0] sm:$0xff]  ;;  %v1469_v51 = vld [vmem:[#allocation10 + $0xb8] sm:$0xff] }
 0x1a7   : > { %v1209_v28 = vpop.f32.mrf.mxu0 }
 0x1a8   : > { %v1220_v30 = vadd.f32 %v1209_v28, %v1098_v23  ;;  %v1239_v45 = vadd.f32 %v1231_v38, %v1219_v29  ;;  %v1246_v57 = vmax.f32 %v1238_v50, 0.0  ;;  %v1690_v23 = vld [vmem:[#allocation10 + $0x1f8] sm:$0xff]  ;;  %v1685_v29 = vld [vmem:[#allocation10 + $0x1d0] sm:$0xff] }
 0x1a9   : > { %v1211_v36 = vpop.f32.mrf.mxu0  ;;  %v1673_v50 = vld [vmem:[#allocation10 + $0x170] sm:$0xff] }
 0x1aa   : > { %v1221_v40 = vadd.f32 %v1211_v36, %v1099_v32  ;;  %v1240_v43 = vadd.f32 %v1227_v34, %v1220_v30  ;;  %v1247_v56 = vmax.f32 %v1239_v45, 0.0  ;;  %v1686_v32 = vld [vmem:[#allocation10 + $0x1d8] sm:$0xff]  ;;  %v1684_v30 = vld [vmem:[#allocation10 + $0x1c8] sm:$0xff] }
 0x1ab   : > { %v1682_v34 = vld [vmem:[#allocation10 + $0x1b8] sm:$0xff]  ;;  %v1680_v36 = vld [vmem:[#allocation10 + $0x1a8] sm:$0xff] }
 0x1ac   : > { %v1241_v47 = vadd.f32 %v1231_v38, %v1221_v40  ;;  %v1248_v54 = vmax.f32 %v1240_v43, 0.0  ;;  %v1678_v38 = vld [vmem:[#allocation10 + $0x198] sm:$0xff]  ;;  %v1677_v40 = vld [vmem:[#allocation10 + $0x190] sm:$0xff]  ;;  %v1471_v45 = vld [vmem:[#allocation10 + $0xc8] sm:$0xff] }
 0x1ad   : > { %v1472_v43 = vld [vmem:[#allocation10 + $0xd0] sm:$0xff] }
 0x1ae   : > { %v1249_v52 = vmax.f32 %v1241_v47, 0.0  ;;  %v1674_v47 = vld [vmem:[#allocation10 + $0x178] sm:$0xff] }
 0x1b0   : > { %3019 = vmatprep.subr.msk.mxu1 %vm1109_vm4, %v1249_v52  ;;  %v1672_v52 = vld [vmem:[#allocation10 + $0x168] sm:$0xff] }
 0x1b1   : > { %3020 = vmatpush1.msk.msra.mxu1 %vm1109_vm4, %v1248_v54  ;;  %v1671_v54 = vld [vmem:[#allocation10 + $0x160] sm:$0xff] }
 0x1b2   : > { %1291 = vmatprep.subr.mxu1 %v1247_v56  ;;  %v1926_v56 = vld [vmem:[#allocation10 + $0x368] sm:$0xf] }
 0x1b3   : > { %1292 = vmatpush1.msra.mxu1 %v1246_v57 }
 0x1b4   : > { %1293 = vmatprep.subr.mxu1 %v1245_v46 }
 0x1b5   : > { %1294 = vmatpush1.msra.mxu1 %v1244_v59 }
 0x1b6   : > { %1295 = vmatprep.subr.mxu1 %v1243_v60 }
 0x1b7   : > { %1296 = vmatpush1.msra.mxu1 %v1242_v58 }
 0x1b8   : > { %3021 = vmatmul.mubr.msk.f32.vlgmr.msra.gmra.mxu1 %vm1252_vm5, %v1250_v61  ;;  %3025 = vmatprep.subr.msk.mxu1 %vm1109_vm4, %v1489_v2 }
 0x1b9   : > { %1335 = vmatprep.mubr.f32.mxu1 %v3796_v0  ;;  %3026 = vmatpush1.msk.msra.mxu1 %vm1109_vm4, %v1488_v5  ;;  %v1464_v5 = vld [vmem:[#allocation10 + $0x98] sm:$0xff] }
 0x1ba   : > { %1518 = vmatprep.subr.mxu1 %v1487_v6  ;;  %v1924_v6 = vld [vmem:[#allocation10 + $0x358] sm:$0xff] }
 0x1bb   : > { %1519 = vmatpush1.msra.mxu1 %v1486_v7  ;;  %v1463_v7 = vld [vmem:[#allocation10 + $0x90] sm:$0xff] }
 0x1bc   : > { %3022 = vmatmul.mubr.msk.f32.gmra.mxu1 %vm1252_vm5, %v1251_v62  ;;  %1520 = vmatprep.subr.mxu1 %v1485_v8  ;;  %v1923_v8 = vld [vmem:[#allocation10 + $0x350] sm:$0xff] }
 0x1bd   : > { %1570 = vmatprep.mubr.f32.mxu1 %v3796_v0  ;;  %1521 = vmatpush1.msra.mxu1 %v1484_v9  ;;  %v1462_v9 = vld [vmem:[#allocation10 + $0x88] sm:$0xff] }
 0x1be   : > { %1522 = vmatprep.subr.mxu1 %v1483_v10  ;;  %v1922_v10 = vld [vmem:[#allocation10 + $0x348] sm:$0xff] }
 0x1bf   : > { %1523 = vmatpush1.msra.mxu1 %v1482_v11  ;;  %v1461_v11 = vld [vmem:[#allocation10 + $0x80] sm:$0xff] }
 0x1c0   : > { %1524 = vmatprep.subr.mxu1 %v1481_v12  ;;  %v1921_v12 = vld [vmem:[#allocation10 + $0x340] sm:$0xff] }
 0x1c1   : > { %1525 = vmatpush1.msra.mxu1 %v1480_v13  ;;  %v1460_v13 = vld [vmem:[#allocation10 + $0x78] sm:$0xff] }
 0x1c2   : > { %1526 = vmatprep.subr.mxu1 %v1479_v14  ;;  %v1920_v14 = vld [vmem:[#allocation10 + $0x338] sm:$0xff] }
 0x1c3   : > { %1527 = vmatpush1.msra.mxu1 %v1478_v15  ;;  %v1459_v15 = vld [vmem:[#allocation10 + $0x70] sm:$0xff] }
 0x1c4   : > { %1528 = vmatprep.subr.mxu1 %v1477_v16  ;;  %v1919_v16 = vld [vmem:[#allocation10 + $0x330] sm:$0xff] }
 0x1c5   : > { %1529 = vmatpush1.msra.mxu1 %v1476_v17  ;;  %v1458_v17 = vld [vmem:[#allocation10 + $0x68] sm:$0xff] }
 0x1c6   : > { %1530 = vmatprep.subr.mxu1 %v1475_v18  ;;  %v1918_v18 = vld [vmem:[#allocation10 + $0x328] sm:$0xff] }
 0x1c7   : > { %1531 = vmatpush1.msra.mxu1 %v1474_v39  ;;  %v1448_v39 = vld [vmem:[#allocation10 + $0x18] sm:$0xff] }
 0x1c8   : > { %1532 = vmatprep.subr.mxu1 %v1473_v41  ;;  %v1447_v41 = vld [vmem:[#allocation10 + $0x10] sm:$0xff] }
 0x1c9   : > { %1533 = vmatpush1.msra.mxu1 %v1472_v43  ;;  %v1446_v43 = vld [vmem:[#allocation10 + $0x8] sm:$0xff] }
 0x1ca   : > { %1534 = vmatprep.subr.mxu1 %v1471_v45  ;;  %v1445_v45 = vld [vmem:[#allocation10] sm:$0xff] }
 0x1cb   : > { %1535 = vmatpush1.msra.mxu1 %v1470_v49  ;;  %v1905_v49 = vld [vmem:[#allocation10 + $0x2c0] sm:$0xff] }
 0x1cc   : > { %1536 = vmatprep.subr.mxu1 %v1469_v51 }
 0x1cd   : > { %1537 = vmatpush1.msra.mxu1 %v1468_v53  ;;  %v1807_v53 = vld [vmem:[#allocation10 + $0x2a8] sm:$0xff] }
 0x1ce   : > { %3029 = vmatprep.subr.msk.mxu1 %vm1109_vm4, %v1466_v55  ;;  %v1806_v55 = vld [vmem:[#allocation10 + $0x2a0] sm:$0xff] }
 0x278   : > { %v1331_v20 = vpop.f32.mrf.mxu1 }
 0x27a   : > { %v1333_v21 = vpop.f32.mrf.mxu1 }
 0x27b   : > { %3023 = vmatprep.mubr.msk.f32.mxu0 %vm1363_vm6, %v1333_v21  ;;  %v1917_v21 = vld [vmem:[#allocation10 + $0x320] sm:$0xff] }
 0x27c   : > { %v1337_v24 = vpop.f32.mrf.mxu1  ;;  %1435 = vmatmul.mubr.f32.vlgmr.msra.gmra.mxu0 %v1331_v20  ;;  %v1457_v20 = vld [vmem:[#allocation10 + $0x60] sm:$0xff] }
 0x27d   : > { %3034 = vmatpush1.msk.msra.mxu0 %vm1109_vm4, %v1691_v22  ;;  %v1456_v22 = vld [vmem:[#allocation10 + $0x58] sm:$0xff] }
 0x27e   : > { %v1339_v28 = vpop.f32.mrf.mxu1  ;;  %1718 = vmatprep.subr.mxu0 %v1690_v23  ;;  %v1916_v23 = vld [vmem:[#allocation10 + $0x318] sm:$0xff] }
 0x27f   : > { %3024 = vmatprep.mubr.msk.f32.mxu0 %vm1363_vm6, %v1339_v28  ;;  %1719 = vmatpush1.msra.mxu0 %v1689_v26  ;;  %v1915_v26 = vld [vmem:[#allocation10 + $0x310] sm:$0xff]  ;;  %v1914_v28 = vld [vmem:[#allocation10 + $0x308] sm:$0xff] }
 0x280   : > { %1440 = vmatmul.mubr.f32.gmra.mxu0 %v1337_v24  ;;  %1720 = vmatprep.subr.mxu0 %v1688_v27  ;;  %v1455_v24 = vld [vmem:[#allocation10 + $0x50] sm:$0xff]  ;;  %v1454_v27 = vld [vmem:[#allocation10 + $0x48] sm:$0xff] }
 0x281   : > { %1721 = vmatpush1.msra.mxu0 %v1687_v31  ;;  %1770 = vmatprep.mubr.f32.mxu0 %v3796_v0  ;;  %v1453_v31 = vld [vmem:[#allocation10 + $0x40] sm:$0xff] }
 0x282   : > { %1722 = vmatprep.subr.mxu0 %v1686_v32  ;;  %v1913_v32 = vld [vmem:[#allocation10 + $0x300] sm:$0xff] }
 0x283   : > { %1723 = vmatpush1.msra.mxu0 %v1685_v29  ;;  %v1452_v29 = vld [vmem:[#allocation10 + $0x38] sm:$0xff] }
 0x284   : > { %1724 = vmatprep.subr.mxu0 %v1684_v30  ;;  %v1912_v30 = vld [vmem:[#allocation10 + $0x2f8] sm:$0xff] }
 0x285   : > { %1725 = vmatpush1.msra.mxu0 %v1683_v33  ;;  %v1451_v33 = vld [vmem:[#allocation10 + $0x30] sm:$0xff] }
 0x286   : > { %1726 = vmatprep.subr.mxu0 %v1682_v34  ;;  %v1911_v34 = vld [vmem:[#allocation10 + $0x2f0] sm:$0xff] }
 0x287   : > { %1727 = vmatpush1.msra.mxu0 %v1681_v35  ;;  %v1450_v35 = vld [vmem:[#allocation10 + $0x28] sm:$0xff] }
 0x288   : > { %1728 = vmatprep.subr.mxu0 %v1680_v36  ;;  %v1910_v36 = vld [vmem:[#allocation10 + $0x2e8] sm:$0xff] }
 0x289   : > { %1729 = vmatpush1.msra.mxu0 %v1679_v37  ;;  %v1449_v37 = vld [vmem:[#allocation10 + $0x20] sm:$0xff] }
 0x28a   : > { %1730 = vmatprep.subr.mxu0 %v1678_v38  ;;  %v1909_v38 = vld [vmem:[#allocation10 + $0x2e0] sm:$0xff] }
 0x28b   : > { %1731 = vmatpush1.msra.mxu0 %v1677_v40  ;;  %v1908_v40 = vld [vmem:[#allocation10 + $0x2d8] sm:$0xff] }
 0x28c   : > { %1732 = vmatprep.subr.mxu0 %v1676_v42  ;;  %v1907_v42 = vld [vmem:[#allocation10 + $0x2d0] sm:$0xff] }
 0x28d   : > { %1733 = vmatpush1.msra.mxu0 %v1675_v44  ;;  %v1906_v44 = vld [vmem:[#allocation10 + $0x2c8] sm:$0xff] }
 0x28e   : > { %1734 = vmatprep.subr.mxu0 %v1674_v47 }
 0x28f   : > { %1735 = vmatpush1.msra.mxu0 %v1673_v50  ;;  %v1809_v50 = vld [vmem:[#allocation10 + $0x2b8] sm:$0xf] }
 0x290   : > { %1736 = vmatprep.subr.mxu0 %v1672_v52  ;;  %v1808_v52 = vld [vmem:[#allocation10 + $0x2b0] sm:$0xf] }
 0x291   : > { %1737 = vmatpush1.msra.mxu0 %v1671_v54 }
 0x292   : > { %3041 = vmatprep.subr.msk.mxu0 %vm1109_vm4, %v1926_v56  ;;  %v1805_v56 = vld [vmem:[#allocation10 + $0x298] sm:$0xff] }
 0x33c   : > { %v4245_v48 = vpop.f32.mrf.mxu0 }
 0x33d   : > { %v1492_v59 = vrot.slane %v4245_v48, 1  ;;  %v1693_v60 = vrot.slane %v4245_v48, 2  ;;  %v1927_v51 = vrot.slane %v4245_v48, 4 }
 0x33e   : > { %v1438_v57 = vpop.f32.mrf.mxu0 }
 0x33f   : > { %v1804_v57 = vld [vmem:[#allocation10 + $0x290] sm:$0xff] }
 0x340   : > { %v4247_v46 = vpop.f32.mrf.mxu0 }
 0x341   : > { %v1493_v58 = vrot.slane %v4247_v46, 1  ;;  %v1694_v61 = vrot.slane %v4247_v46, 2  ;;  %v1928_v47 = vrot.slane %v4247_v46, 4 }
 0x342   : > { %v1443_v62 = vpop.f32.mrf.mxu0 }
 0x343   : > { %v1494_v2 = vsel %vm653_vm0, %v1492_v59, %v1493_v58  ;;  %v1695_v3 = vsel %vm865_vm2, %v1693_v60, %v1694_v61  ;;  %v1929_v54 = vsel %vm1109_vm4, %v1927_v51, %v1928_v47  ;;  %v1803_v59 = vld [vmem:[#allocation10 + $0x288] sm:$0xff]  ;;  %v1802_v60 = vld [vmem:[#allocation10 + $0x280] sm:$0xff] }
 0x344   : > { %3027 = vmatmul.mubr.msk.f32.vlgmr.msra.gmra.mxu1 %vm1495_vm7, %v1494_v2  ;;  %3035 = vmatmul.mubr.msk.f32.vlgmr.msra.gmra.mxu0 %vm1495_vm7, %v1695_v3  ;;  %v1799_v62 = vld [vmem:[#allocation10 + $0x268] sm:$0xff]  ;;  %v1796_v2 = vld [vmem:[#allocation10 + $0x250] sm:$0xff] }
 0x345   : > { %3030 = vmatpush1.msk.msra.mxu1 %vm1109_vm4, %v1465_v63  ;;  %3042 = vmatpush1.msk.msra.mxu0 %vm1109_vm4, %v1925_v1  ;;  %v1798_v63 = vld [vmem:[#allocation10 + $0x260] sm:$0xff]  ;;  %v1797_v1 = vld [vmem:[#allocation10 + $0x258] sm:$0xff]  ;;  %v1795_v3 = vld [vmem:[#allocation10 + $0x248] sm:$0xff] }
 0x346   : > { %1605 = vmatprep.subr.mxu1 %v1464_v5  ;;  %1952 = vmatprep.subr.mxu0 %v1924_v6  ;;  %v1794_v5 = vld [vmem:[#allocation10 + $0x240] sm:$0xff]  ;;  %v1793_v6 = vld [vmem:[#allocation10 + $0x238] sm:$0xff] }
 0x347   : > { %1606 = vmatpush1.msra.mxu1 %v1463_v7  ;;  %1953 = vmatpush1.msra.mxu0 %v1923_v8  ;;  %v1792_v7 = vld [vmem:[#allocation10 + $0x230] sm:$0xff]  ;;  %v1791_v8 = vld [vmem:[#allocation10 + $0x228] sm:$0xff] }
 0x348   : > { %1576 = vmatprep.mubr.f32.mxu1 %v3796_v0  ;;  %1607 = vmatprep.subr.mxu1 %v1462_v9  ;;  %v1790_v9 = vld [vmem:[#allocation10 + $0x220] sm:$0xff] }
 0x349   : > { %1776 = vmatprep.mubr.f32.mxu0 %v3796_v0  ;;  %1954 = vmatprep.subr.mxu0 %v1922_v10  ;;  %v1811_v10 = vrot.slane %v4247_v46, 3 }
 0x34a   : > { %3028 = vmatmul.mubr.msk.f32.gmra.mxu1 %vm1495_vm7, %v1493_v58  ;;  %3036 = vmatmul.mubr.msk.f32.gmra.mxu0 %vm1495_vm7, %v1694_v61  ;;  %v1801_v58 = vld [vmem:[#allocation10 + $0x278] sm:$0xff]  ;;  %v1800_v61 = vld [vmem:[#allocation10 + $0x270] sm:$0xff] }
 0x34b   : > { %1608 = vmatpush1.msra.mxu1 %v1461_v11  ;;  %1955 = vmatpush1.msra.mxu0 %v1921_v12  ;;  %v1789_v11 = vld [vmem:[#allocation10 + $0x218] sm:$0xff]  ;;  %v1788_v12 = vld [vmem:[#allocation10 + $0x210] sm:$0xff] }
 0x34c   : > { %1609 = vmatprep.subr.mxu1 %v1460_v13  ;;  %1956 = vmatprep.subr.mxu0 %v1920_v14  ;;  %v1810_v13 = vrot.slane %v4245_v48, 3 }
 0x34d   : > { %1610 = vmatpush1.msra.mxu1 %v1459_v15  ;;  %1957 = vmatpush1.msra.mxu0 %v1919_v16 }
 0x34e   : > { %1611 = vmatprep.subr.mxu1 %v1458_v17  ;;  %1958 = vmatprep.subr.mxu0 %v1918_v18  ;;  %v1812_v14 = vsel %vm987_vm3, %v1810_v13, %v1811_v10  ;;  %v2126_v13 = vld [vmem:[#allocation11 + $0x10] sm:$0xff] }
 0x34f   : > { %1612 = vmatpush1.msra.mxu1 %v1457_v20  ;;  %1959 = vmatpush1.msra.mxu0 %v1917_v21 }
 0x350   : > { %1613 = vmatprep.subr.mxu1 %v1456_v22  ;;  %1960 = vmatprep.subr.mxu0 %v1916_v23 }
 0x351   : > { %1614 = vmatpush1.msra.mxu1 %v1455_v24  ;;  %1961 = vmatpush1.msra.mxu0 %v1915_v26 }
 0x352   : > { %1615 = vmatprep.subr.mxu1 %v1454_v27  ;;  %1962 = vmatprep.subr.mxu0 %v1914_v28 }
 0x353   : > { %1616 = vmatpush1.msra.mxu1 %v1453_v31  ;;  %1963 = vmatpush1.msra.mxu0 %v1913_v32 }
 0x354   : > { %1617 = vmatprep.subr.mxu1 %v1452_v29  ;;  %1964 = vmatprep.subr.mxu0 %v1912_v30 }
 0x355   : > { %1618 = vmatpush1.msra.mxu1 %v1451_v33  ;;  %1965 = vmatpush1.msra.mxu0 %v1911_v34 }
 0x356   : > { %1619 = vmatprep.subr.mxu1 %v1450_v35  ;;  %1966 = vmatprep.subr.mxu0 %v1910_v36 }
 0x357   : > { %1620 = vmatpush1.msra.mxu1 %v1449_v37  ;;  %1967 = vmatpush1.msra.mxu0 %v1909_v38 }
 0x358   : > { %1621 = vmatprep.subr.mxu1 %v1448_v39  ;;  %1968 = vmatprep.subr.mxu0 %v1908_v40 }
 0x359   : > { %1622 = vmatpush1.msra.mxu1 %v1447_v41  ;;  %1969 = vmatpush1.msra.mxu0 %v1907_v42  ;;  %v2021_v42 = vld [vmem:[%s4482_s6] sm:$0x3] }
 0x35a   : > { %1623 = vmatprep.subr.mxu1 %v1446_v43  ;;  %1970 = vmatprep.subr.mxu0 %v1906_v44  ;;  %v2030_v51 = vrot.slane %v2021_v42, %v1230_v25  ;;  %v2041_v25 = vld [vmem:[%s4483_s7] sm:$0x1f] }
 0x35b   : > { %1624 = vmatpush1.msra.mxu1 %v1445_v45  ;;  %1657 = vmatprep.mubr.f32.mxu1 %v3796_v0 }
 0x35c   : > { %1971 = vmatpush1.msra.mxu0 %v1905_v49  ;;  %2004 = vmatprep.mubr.f32.mxu0 %v3796_v0 }
 0x35d   : > { %3031 = vmatmul.mubr.msk.f32.vlgmr.msra.gmra.mxu1 %vm1495_vm7, %v4245_v48  ;;  %3037 = vmatprep.subr.msk.mxu1 %vm1109_vm4, %v1809_v50 }
 0x35e   : > { %3043 = vmatmul.mubr.msk.f32.vlgmr.msra.gmra.mxu0 %vm1495_vm7, %v1929_v54  ;;  %3038 = vmatpush1.msk.msra.mxu1 %vm1109_vm4, %v1808_v52  ;;  %v2026_v54 = vrot.slane %v2021_v42, %v1226_v19  ;;  %v2138_v19 = vld [vmem:[#allocation11 + $0x70] sm:$0xff]  ;;  %v2313_v42 = vld [vmem:[#allocation13 + $0x98] sm:$0xff] }
 0x35f   : > { %1835 = vmatprep.subr.mxu1 %v1807_v53  ;;  %1663 = vmatprep.mubr.f32.mxu1 %v3796_v0 }
 0x360   : > { %1836 = vmatpush1.msra.mxu1 %v1806_v55  ;;  %2010 = vmatprep.mubr.f32.mxu0 %v3796_v0 }
 0x361   : > { %3032 = vmatmul.mubr.msk.f32.gmra.mxu1 %vm1495_vm7, %v4247_v46  ;;  %1837 = vmatprep.subr.mxu1 %v1805_v56 }
 0x362   : > { %3044 = vmatmul.mubr.msk.f32.gmra.mxu0 %vm1495_vm7, %v1928_v47  ;;  %1838 = vmatpush1.msra.mxu1 %v1804_v57 }
 0x363   : > { %1839 = vmatprep.subr.mxu1 %v1803_v59  ;;  %1887 = vmatprep.mubr.f32.mxu1 %v3796_v0 }
 0x364   : > { %1840 = vmatpush1.msra.mxu1 %v1802_v60  ;;  %3147 = vmatprep.subr.mxu0 %v3796_v0 }
 0x365   : > { %1841 = vmatprep.subr.mxu1 %v1801_v58  ;;  %3167 = vmatprep.mubr.msk.f32.mxu0 %vm3797_vm10, %v3796_v0 }
 0x366   : > { %1842 = vmatpush1.msra.mxu1 %v1800_v61 }
 0x367   : > { %1843 = vmatprep.subr.mxu1 %v1799_v62 }
 0x368   : > { %1844 = vmatpush1.msra.mxu1 %v1798_v63 }
 0x369   : > { %1845 = vmatprep.subr.mxu1 %v1797_v1  ;;  %v2137_v1 = vld [vmem:[#allocation11 + $0x68] sm:$0xff] }
 0x36a   : > { %1846 = vmatpush1.msra.mxu1 %v1796_v2  ;;  %v2136_v2 = vld [vmem:[#allocation11 + $0x60] sm:$0xff] }
 0x36b   : > { %1847 = vmatprep.subr.mxu1 %v1795_v3  ;;  %v2135_v3 = vld [vmem:[#allocation11 + $0x58] sm:$0xff] }
 0x36c   : > { %1848 = vmatpush1.msra.mxu1 %v1794_v5  ;;  %v2134_v5 = vld [vmem:[#allocation11 + $0x50] sm:$0xff] }
 0x36d   : > { %1849 = vmatprep.subr.mxu1 %v1793_v6  ;;  %v2133_v6 = vld [vmem:[#allocation11 + $0x48] sm:$0xff] }
 0x36e   : > { %1850 = vmatpush1.msra.mxu1 %v1792_v7  ;;  %v2132_v7 = vld [vmem:[#allocation11 + $0x40] sm:$0xff] }
 0x36f   : > { %1851 = vmatprep.subr.mxu1 %v1791_v8  ;;  %v2131_v8 = vld [vmem:[#allocation11 + $0x38] sm:$0xff] }
 0x370   : > { %1852 = vmatpush1.msra.mxu1 %v1790_v9  ;;  %v2130_v9 = vld [vmem:[#allocation11 + $0x30] sm:$0xff] }
 0x371   : > { %1853 = vmatprep.subr.mxu1 %v1789_v11  ;;  %v2128_v11 = vld [vmem:[#allocation11 + $0x20] sm:$0xff] }
 0x372   : > { %1854 = vmatpush1.msra.mxu1 %v1788_v12  ;;  %v2127_v12 = vld [vmem:[#allocation11 + $0x18] sm:$0xff] }
 0x373   : > { %3039 = vmatmul.mubr.msk.f32.vlgmr.msra.gmra.mxu1 %vm1495_vm7, %v1812_v14  ;;  %v2125_v14 = vld [vmem:[#allocation11 + $0x8] sm:$0xff] }
 0x374   : > { %1893 = vmatprep.mubr.f32.mxu1 %v3796_v0 }
 0x377   : > { %3040 = vmatmul.mubr.msk.f32.gmra.mxu1 %vm1495_vm7, %v1811_v10  ;;  %v2129_v10 = vld [vmem:[#allocation11 + $0x28] sm:$0xff] }
 0x378   : > { %2117 = vmatprep.mubr.f32.mxu1 %v3796_v0 }
 0x404   : > { %v1572_v46 = vpop.f32.mrf.mxu1  ;;  %v1772_v17 = vpop.f32.mrf.mxu0 }
 0x406   : > { %v1574_v15 = vpop.f32.mrf.mxu1  ;;  %v1774_v20 = vpop.f32.mrf.mxu0 }
 0x40a   : > { %v1578_v16 = vpop.f32.mrf.mxu1  ;;  %v1778_v21 = vpop.f32.mrf.mxu0 }
 0x40c   : > { %v1580_v18 = vpop.f32.mrf.mxu1  ;;  %v1780_v23 = vpop.f32.mrf.mxu0 }
 0x41d   : > { %v1659_v48 = vpop.f32.mrf.mxu1 }
 0x41e   : > { %v2006_v26 = vpop.f32.mrf.mxu0  ;;  %v1660_v28 = vadd.f32 %v1659_v48, %v1572_v46  ;;  %v2124_v46 = vld [vmem:[#allocation11] sm:$0xff] }
 0x41f   : > { %v1661_v22 = vpop.f32.mrf.mxu1  ;;  %v2226_v48 = vld [vmem:[#allocation13 + $0x40] sm:$0xff] }
 0x420   : > { %v1662_v27 = vadd.f32 %v1661_v22, %v1574_v15  ;;  %v2008_v29 = vpop.f32.mrf.mxu0  ;;  %v1783_v35 = vadd.f32 %v1772_v17, %v1660_v28  ;;  %v2143_v15 = vld [vmem:[#allocation11 + $0x98] sm:$0xff]  ;;  %v2141_v17 = vld [vmem:[#allocation11 + $0x88] sm:$0xff]  ;;  %v2224_v22 = vld [vmem:[#allocation13 + $0x30] sm:$0xff] }
 0x421   : > { %v1665_v24 = vpop.f32.mrf.mxu1  ;;  %v2219_v28 = vld [vmem:[#allocation13 + $0x8] sm:$0xff] }
 0x422   : > { %v1666_v32 = vadd.f32 %v1665_v24, %v1578_v16  ;;  %v1784_v34 = vadd.f32 %v1774_v20, %v1662_v27  ;;  %v2012_v39 = vpop.f32.mrf.mxu0  ;;  %v2142_v16 = vld [vmem:[#allocation11 + $0x90] sm:$0xff]  ;;  %v2227_v20 = vld [vmem:[#allocation13 + $0x48] sm:$0xff]  ;;  %v2222_v24 = vld [vmem:[#allocation13 + $0x20] sm:$0xff] }
 0x423   : > { %v1667_v31 = vpop.f32.mrf.mxu1  ;;  %3148 = vmatpush3.msra.mxu0 %v2227_v20  ;;  %v2220_v27 = vld [vmem:[#allocation13 + $0x10] sm:$0xff]  ;;  %v2654_v20 = vld [vmem:[#allocation14 + $0x50] sm:$0xff] }
 0x424   : > { %v1668_v33 = vadd.f32 %v1667_v31, %v1580_v18  ;;  %v1785_v38 = vadd.f32 %v1778_v21, %v1666_v32  ;;  %v2014_v52 = vpop.f32.mrf.mxu0  ;;  %v2140_v18 = vld [vmem:[#allocation11 + $0x80] sm:$0xff]  ;;  %3149 = vmatprep.subr.mxu0 %v3796_v0  ;;  %v2225_v21 = vld [vmem:[#allocation13 + $0x38] sm:$0xff] }
 0x425   : > { %3150 = vmatpush3.msra.mxu0 %v2226_v48  ;;  %v2218_v31 = vld [vmem:[#allocation13] sm:$0xff]  ;;  %v2653_v48 = vld [vmem:[#allocation14 + $0x48] sm:$0xff] }
 0x426   : > { %v1786_v44 = vadd.f32 %v1780_v23, %v1668_v33  ;;  %3151 = vmatprep.subr.mxu0 %v3796_v0  ;;  %v2223_v23 = vld [vmem:[#allocation13 + $0x28] sm:$0xff]  ;;  %v2397_v33 = vld [vmem:[#allocation13 + $0xe0] sm:$0xff] }
 0x427   : > { %3152 = vmatpush3.msra.mxu0 %v2225_v21  ;;  %v2652_v21 = vld [vmem:[#allocation14 + $0x40] sm:$0xff] }
 0x428   : > { %3153 = vmatprep.subr.mxu0 %v3796_v0 }
 0x429   : > { %3154 = vmatpush3.msra.mxu0 %v2224_v22  ;;  %v2651_v22 = vld [vmem:[#allocation14 + $0x38] sm:$0xff] }
 0x42a   : > { %3155 = vmatprep.subr.mxu0 %v3796_v0 }
 0x42b   : > { %3156 = vmatpush3.msra.mxu0 %v2223_v23  ;;  %v2650_v23 = vld [vmem:[#allocation14 + $0x30] sm:$0xff] }
 0x42c   : > { %3157 = vmatprep.subr.mxu0 %v3796_v0 }
 0x42d   : > { %3158 = vmatpush3.msra.mxu0 %v2222_v24  ;;  %v2649_v24 = vld [vmem:[#allocation14 + $0x28] sm:$0xff] }
 0x42e   : > { %3159 = vmatprep.subr.mxu0 %v3796_v0 }
 0x433   : > { %v1889_v30 = vpop.f32.mrf.mxu1 }
 0x434   : > { %v1900_v40 = vadd.f32 %v1889_v30, %v1783_v35  ;;  %v2398_v30 = vld [vmem:[#allocation13 + $0xe8] sm:$0xff]  ;;  %v2395_v35 = vld [vmem:[#allocation13 + $0xd0] sm:$0xff] }
 0x435   : > { %v1891_v36 = vpop.f32.mrf.mxu1 }
 0x436   : > { %v1901_v37 = vadd.f32 %v1891_v36, %v1784_v34  ;;  %v2017_v53 = vadd.f32 %v2006_v26, %v1900_v40  ;;  %v2221_v26 = vld [vmem:[#allocation13 + $0x18] sm:$0xff]  ;;  %v2394_v36 = vld [vmem:[#allocation13 + $0xc8] sm:$0xff] }
 0x437   : > { %v1895_v41 = vpop.f32.mrf.mxu1  ;;  %3160 = vmatpush3.msra.mxu0 %v2221_v26  ;;  %v2396_v34 = vld [vmem:[#allocation13 + $0xd8] sm:$0xff]  ;;  %v2390_v40 = vld [vmem:[#allocation13 + $0xa8] sm:$0xff]  ;;  %v2648_v26 = vld [vmem:[#allocation14 + $0x20] sm:$0xff] }
 0x438   : > { %v1902_v43 = vadd.f32 %v1895_v41, %v1785_v38  ;;  %v2018_v47 = vadd.f32 %v2008_v29, %v1901_v37  ;;  %v2033_v60 = vadd.f32 %v2026_v54, %v2017_v53  ;;  %3161 = vmatprep.subr.mxu0 %v3796_v0  ;;  %v2393_v37 = vld [vmem:[#allocation13 + $0xc0] sm:$0xff]  ;;  %v2392_v38 = vld [vmem:[#allocation13 + $0xb8] sm:$0xff] }
 0x439   : > { %v1897_v45 = vpop.f32.mrf.mxu1  ;;  %3162 = vmatpush3.msra.mxu0 %v2220_v27  ;;  %v2389_v41 = vld [vmem:[#allocation13 + $0xa0] sm:$0xff]  ;;  %v2566_v53 = vld [vmem:[#allocation13 + $0x178] sm:$0xff]  ;;  %v2647_v27 = vld [vmem:[#allocation14 + $0x18] sm:$0xff] }
 0x43a   : > { %v2019_v49 = vadd.f32 %v2012_v39, %v1902_v43  ;;  %v1903_v50 = vadd.f32 %v1897_v45, %v1786_v44  ;;  %v2034_v59 = vadd.f32 %v2030_v51, %v2018_v47  ;;  %v2037_v63 = vmax.f32 %v2033_v60, 0.0  ;;  %3163 = vmatprep.subr.mxu0 %v3796_v0  ;;  %v2391_v39 = vld [vmem:[#allocation13 + $0xb0] sm:$0xff]  ;;  %v2568_v47 = vld [vmem:[#allocation13 + $0x188] sm:$0xff]  ;;  %v2563_v60 = vld [vmem:[#allocation13 + $0x160] sm:$0xff] }
 0x43b   : > { %3164 = vmatpush3.msra.mxu0 %v2219_v28  ;;  %v2312_v45 = vld [vmem:[#allocation13 + $0x90] sm:$0xff]  ;;  %v2646_v28 = vld [vmem:[#allocation14 + $0x10] sm:$0xff] }
 0x43c   : > { %v2020_v55 = vadd.f32 %v2014_v52, %v1903_v50  ;;  %v2035_v56 = vadd.f32 %v2026_v54, %v2019_v49  ;;  %v2038_v62 = vmax.f32 %v2034_v59, 0.0  ;;  %3165 = vmatprep.subr.mxu0 %v3796_v0  ;;  %v2311_v50 = vld [vmem:[#allocation13 + $0x88] sm:$0xff]  ;;  %v2310_v52 = vld [vmem:[#allocation13 + $0x80] sm:$0xff]  ;;  %v2309_v54 = vld [vmem:[#allocation13 + $0x78] sm:$0xff] }
 0x43d   : > { %3166 = vmatpush3.msra.mxu0 %v2218_v31  ;;  %v2307_v59 = vld [vmem:[#allocation13 + $0x68] sm:$0xff]  ;;  %v2645_v31 = vld [vmem:[#allocation14 + $0x8] sm:$0xff] }
 0x43e   : > { %v2036_v57 = vadd.f32 %v2030_v51, %v2020_v55  ;;  %v2039_v61 = vmax.f32 %v2035_v56, 0.0  ;;  %3170 = vmatprep.subr.mxu0 %v3796_v0  ;;  %v2567_v51 = vld [vmem:[#allocation13 + $0x180] sm:$0xff]  ;;  %v2565_v55 = vld [vmem:[#allocation13 + $0x170] sm:$0xff] }
 0x43f   : > { %v2308_v56 = vld [vmem:[#allocation13 + $0x70] sm:$0xff] }
 0x440   : > { %v2040_v58 = vmax.f32 %v2036_v57, 0.0  ;;  %v2564_v57 = vld [vmem:[#allocation13 + $0x168] sm:$0xff] }
 0x442   : > { %3045 = vmatprep.subr.msk.mxu1 %vm2046_vm8, %v2040_v58  ;;  %v2306_v58 = vld [vmem:[#allocation13 + $0x60] sm:$0xff] }
 0x443   : > { %3046 = vmatpush1.msk.msra.mxu1 %vm2046_vm8, %v2039_v61  ;;  %v2562_v61 = vld [vmem:[#allocation13 + $0x158] sm:$0xff] }
 0x444   : > { %2083 = vmatprep.subr.mxu1 %v2038_v62  ;;  %v2305_v62 = vld [vmem:[#allocation13 + $0x58] sm:$0xff] }
 0x445   : > { %2084 = vmatpush1.msra.mxu1 %v2037_v63  ;;  %v2561_v63 = vld [vmem:[#allocation13 + $0x150] sm:$0xff] }
 0x446   : > { %3047 = vmatmul.mubr.msk.f32.vlgmr.msra.gmra.mxu1 %vm2042_vm9, %v2041_v25  ;;  %2147 = vmatprep.subr.mxu1 %v3796_v0  ;;  %v2304_v25 = vld [vmem:[#allocation13 + $0x50] sm:$0xff] }
 0x447   : > { %2148 = vmatpush1.msra.mxu1 %v2139_v4  ;;  %v2560_v4 = vld [vmem:[#allocation13 + $0x148] sm:$0xff] }
 0x448   : > { %2149 = vmatprep.subr.mxu1 %v3796_v0 }
 0x449   : > { %2150 = vmatpush1.msra.mxu1 %v2138_v19 }
 0x44a   : > { %2151 = vmatprep.subr.mxu1 %v3796_v0 }
 0x44b   : > { %2152 = vmatpush1.msra.mxu1 %v2137_v1  ;;  %v2483_v1 = vld [vmem:[#allocation13 + $0x138] sm:$0xff] }
 0x44c   : > { %2153 = vmatprep.subr.mxu1 %v3796_v0 }
 0x44d   : > { %2154 = vmatpush1.msra.mxu1 %v2136_v2  ;;  %v2559_v2 = vld [vmem:[#allocation13 + $0x140] sm:$0xff] }
 0x44e   : > { %2155 = vmatprep.subr.mxu1 %v3796_v0 }
 0x44f   : > { %2156 = vmatpush1.msra.mxu1 %v2135_v3 }
 0x450   : > { %2157 = vmatprep.subr.mxu1 %v3796_v0 }
 0x451   : > { %2158 = vmatpush1.msra.mxu1 %v2134_v5  ;;  %v2482_v5 = vld [vmem:[#allocation13 + $0x130] sm:$0xff] }
 0x452   : > { %2159 = vmatprep.subr.mxu1 %v3796_v0 }
 0x453   : > { %2160 = vmatpush1.msra.mxu1 %v2133_v6  ;;  %v2481_v6 = vld [vmem:[#allocation13 + $0x128] sm:$0xff] }
 0x454   : > { %2161 = vmatprep.subr.mxu1 %v3796_v0 }
 0x455   : > { %2162 = vmatpush1.msra.mxu1 %v2132_v7  ;;  %v2480_v7 = vld [vmem:[#allocation13 + $0x120] sm:$0xff] }
 0x456   : > { %2163 = vmatprep.subr.mxu1 %v3796_v0 }
 0x457   : > { %2164 = vmatpush1.msra.mxu1 %v2131_v8  ;;  %v2479_v8 = vld [vmem:[#allocation13 + $0x118] sm:$0xff] }
 0x458   : > { %2165 = vmatprep.subr.mxu1 %v3796_v0 }
 0x459   : > { %2166 = vmatpush1.msra.mxu1 %v2130_v9  ;;  %v2478_v9 = vld [vmem:[#allocation13 + $0x110] sm:$0xff] }
 0x45a   : > { %2167 = vmatprep.subr.mxu1 %v3796_v0 }
 0x45b   : > { %2168 = vmatpush1.msra.mxu1 %v2129_v10  ;;  %v2477_v10 = vld [vmem:[#allocation13 + $0x108] sm:$0xff] }
 0x45c   : > { %2169 = vmatprep.subr.mxu1 %v3796_v0 }
 0x45d   : > { %2170 = vmatpush1.msra.mxu1 %v2128_v11  ;;  %v2476_v11 = vld [vmem:[#allocation13 + $0x100] sm:$0xff] }
 0x45e   : > { %2171 = vmatprep.subr.mxu1 %v3796_v0 }
 0x45f   : > { %2172 = vmatpush1.msra.mxu1 %v2127_v12  ;;  %v2475_v12 = vld [vmem:[#allocation13 + $0xf8] sm:$0xff] }
 0x460   : > { %2173 = vmatprep.subr.mxu1 %v3796_v0 }
 0x461   : > { %2174 = vmatpush1.msra.mxu1 %v2126_v13  ;;  %v2474_v13 = vld [vmem:[#allocation13 + $0xf0] sm:$0xff] }
 0x462   : > { %2175 = vmatprep.subr.mxu1 %v3796_v0 }
 0x463   : > { %2176 = vmatpush1.msra.mxu1 %v2125_v14 }
 0x464   : > { %2177 = vmatprep.subr.mxu1 %v3796_v0 }
 0x465   : > { %2178 = vmatpush1.msra.mxu1 %v2124_v46  ;;  %v2659_v46 = vld [vmem:[#allocation14 + $0x78] sm:$0xff] }
 0x466   : > { %2203 = vmatprep.subr.mxu1 %v3796_v0 }
 0x467   : > { %2204 = vmatpush2.msra.mxu1 %v2143_v15  ;;  %v2658_v15 = vld [vmem:[#allocation14 + $0x70] sm:$0xff] }
 0x468   : > { %2205 = vmatprep.subr.mxu1 %v3796_v0 }
 0x469   : > { %2206 = vmatpush2.msra.mxu1 %v2142_v16  ;;  %v2657_v16 = vld [vmem:[#allocation14 + $0x68] sm:$0xff] }
 0x46a   : > { %2207 = vmatprep.subr.mxu1 %v3796_v0 }
 0x46b   : > { %2208 = vmatpush2.msra.mxu1 %v2141_v17  ;;  %v2656_v17 = vld [vmem:[#allocation14 + $0x60] sm:$0xff] }
 0x46c   : > { %2209 = vmatprep.subr.mxu1 %v3796_v0 }
 0x46d   : > { %2210 = vmatpush2.msra.mxu1 %v2140_v18  ;;  %v2655_v18 = vld [vmem:[#allocation14 + $0x58] sm:$0xff] }
 0x46e   : > { %3193 = vmatprep.subr.mxu1 %v3796_v0 }
 0x506   : > { %v2119_v32 = vpop.f32.mrf.mxu1 }
 0x508   : > { %v2121_v29 = vpop.f32.mrf.mxu1 }
 0x509   : > { %3048 = vmatprep.mubr.msk.f32.mxu1 %vm661_vm1, %v2121_v29  ;;  %v2747_v29 = vld [vmem:[#allocation16 + $0x78] sm:$0xff] }
 0x50a   : > { %2212 = vmatmul.mubr.f32.vlgmr.msra.gmra.mxu1 %v2119_v32  ;;  %v2644_v32 = vld [vmem:[#allocation14] sm:$0xff] }
 0x50b   : > { %3194 = vmatpush3.msra.mxu1 %v2398_v30  ;;  %3213 = vmatprep.mubr.msk.f32.mxu1 %vm3797_vm10, %v3796_v0  ;;  %v2746_v30 = vld [vmem:[#allocation16 + $0x70] sm:$0xff] }
 0x50c   : > { %3195 = vmatprep.subr.mxu1 %v3796_v0 }
 0x50d   : > { %3196 = vmatpush3.msra.mxu1 %v2397_v33  ;;  %v2745_v33 = vld [vmem:[#allocation16 + $0x68] sm:$0xff] }
 0x50e   : > { %3197 = vmatprep.subr.mxu1 %v3796_v0 }
 0x50f   : > { %3198 = vmatpush3.msra.mxu1 %v2396_v34  ;;  %v2744_v34 = vld [vmem:[#allocation16 + $0x60] sm:$0xff] }
 0x510   : > { %3199 = vmatprep.subr.mxu1 %v3796_v0 }
 0x511   : > { %3200 = vmatpush3.msra.mxu1 %v2395_v35  ;;  %v2743_v35 = vld [vmem:[#allocation16 + $0x58] sm:$0xff] }
 0x512   : > { %3201 = vmatprep.subr.mxu1 %v3796_v0 }
 0x513   : > { %3202 = vmatpush3.msra.mxu1 %v2394_v36  ;;  %v2742_v36 = vld [vmem:[#allocation16 + $0x50] sm:$0xff] }
 0x514   : > { %3203 = vmatprep.subr.mxu1 %v3796_v0 }
 0x515   : > { %3204 = vmatpush3.msra.mxu1 %v2393_v37  ;;  %v2741_v37 = vld [vmem:[#allocation16 + $0x48] sm:$0xff] }
 0x516   : > { %3205 = vmatprep.subr.mxu1 %v3796_v0 }
 0x517   : > { %3206 = vmatpush3.msra.mxu1 %v2392_v38  ;;  %v2740_v38 = vld [vmem:[#allocation16 + $0x40] sm:$0xff] }
 0x518   : > { %3207 = vmatprep.subr.mxu1 %v3796_v0 }
 0x519   : > { %3208 = vmatpush3.msra.mxu1 %v2391_v39  ;;  %v2739_v39 = vld [vmem:[#allocation16 + $0x38] sm:$0xff] }
 0x51a   : > { %3209 = vmatprep.subr.mxu1 %v3796_v0 }
 0x51b   : > { %3210 = vmatpush3.msra.mxu1 %v2390_v40  ;;  %v2738_v40 = vld [vmem:[#allocation16 + $0x30] sm:$0xff] }
 0x51c   : > { %3211 = vmatprep.subr.mxu1 %v3796_v0 }
 0x51d   : > { %3212 = vmatpush3.msra.mxu1 %v2389_v41  ;;  %v2737_v41 = vld [vmem:[#allocation16 + $0x28] sm:$0xff] }
 0x51e   : > { %3239 = vmatprep.subr.mxu1 %v3796_v0 }
 0x5ca   : > { %v4343_v43 = vpop.f32.mrf.mxu1 }
 0x5cb   : > { %v2399_v44 = vrot.slane %v4343_v43, 2  ;;  %3168 = vmatmul.mubr.msk.f32.vlgmr.msra.gmra.mxu0 %vm2228_vm11, %v4343_v43  ;;  %v2314_v19 = vrot.slane %v4343_v43, 1  ;;  %v2569_v3 = vrot.slane %v4343_v43, 4  ;;  %v2484_v14 = vrot.slane %v4343_v43, 3  ;;  %v2735_v43 = vld [vmem:[#allocation16 + $0x18] sm:$0xff] }
 0x5cc   : > { %3171 = vmatpush3.msra.mxu0 %v2313_v42  ;;  %v2215_v49 = vpop.f32.mrf.mxu1  ;;  %3190 = vmatprep.mubr.msk.f32.mxu0 %vm3797_vm10, %v3796_v0  ;;  %v2736_v42 = vld [vmem:[#allocation16 + $0x20] sm:$0xff] }
 0x5cd   : > { %3172 = vmatprep.subr.mxu0 %v3796_v0  ;;  %3214 = vmatmul.mubr.msk.f32.vlgmr.msra.gmra.mxu1 %vm2228_vm11, %v2399_v44 }
 0x5ce   : > { %3173 = vmatpush3.msra.mxu0 %v2312_v45  ;;  %3240 = vmatpush3.msra.mxu1 %v2568_v47 }
 0x5cf   : > { %3174 = vmatprep.subr.mxu0 %v3796_v0  ;;  %3241 = vmatprep.subr.mxu1 %v3796_v0 }
 0x5d0   : > { %3175 = vmatpush3.msra.mxu0 %v2311_v50  ;;  %3242 = vmatpush3.msra.mxu1 %v2567_v51 }
 0x5d1   : > { %3176 = vmatprep.subr.mxu0 %v3796_v0  ;;  %3243 = vmatprep.subr.mxu1 %v3796_v0 }
 0x5d2   : > { %3177 = vmatpush3.msra.mxu0 %v2310_v52  ;;  %3244 = vmatpush3.msra.mxu1 %v2566_v53 }
 0x5d3   : > { %3178 = vmatprep.subr.mxu0 %v3796_v0  ;;  %3245 = vmatprep.subr.mxu1 %v3796_v0 }
 0x5d4   : > { %3179 = vmatpush3.msra.mxu0 %v2309_v54  ;;  %3246 = vmatpush3.msra.mxu1 %v2565_v55  ;;  %v2217_v54 = vld [vmem:[%s4486_s10] sm:$0x1] }
 0x5d5   : > { %3180 = vmatprep.subr.mxu0 %v3796_v0  ;;  %3247 = vmatprep.subr.mxu1 %v3796_v0 }
 0x5d6   : > { %3181 = vmatpush3.msra.mxu0 %v2308_v56  ;;  %3248 = vmatpush3.msra.mxu1 %v2564_v57 }
 0x5d7   : > { %3182 = vmatprep.subr.mxu0 %v3796_v0  ;;  %3249 = vmatprep.subr.mxu1 %v3796_v0 }
 0x5d8   : > { %3183 = vmatpush3.msra.mxu0 %v2307_v59  ;;  %3250 = vmatpush3.msra.mxu1 %v2563_v60 }
 0x5d9   : > { %3184 = vmatprep.subr.mxu0 %v3796_v0  ;;  %3251 = vmatprep.subr.mxu1 %v3796_v0 }
 0x5da   : > { %3185 = vmatpush3.msra.mxu0 %v2306_v58  ;;  %3252 = vmatpush3.msra.mxu1 %v2562_v61 }
 0x5db   : > { %3186 = vmatprep.subr.mxu0 %v3796_v0  ;;  %3253 = vmatprep.subr.mxu1 %v3796_v0 }
 0x5dc   : > { %3187 = vmatpush3.msra.mxu0 %v2305_v62  ;;  %3254 = vmatpush3.msra.mxu1 %v2561_v63  ;;  %v2734_v63 = vld [vmem:[#allocation16 + $0x10] sm:$0xff] }
 0x5dd   : > { %3188 = vmatprep.subr.mxu0 %v3796_v0  ;;  %3255 = vmatprep.subr.mxu1 %v3796_v0 }
 0x5de   : > { %3189 = vmatpush3.msra.mxu0 %v2304_v25  ;;  %3256 = vmatpush3.msra.mxu1 %v2560_v4  ;;  %v2733_v25 = vld [vmem:[#allocation16 + $0x8] sm:$0xff]  ;;  %v2732_v4 = vld [vmem:[#allocation16] sm:$0xff] }
 0x5df   : > { %3191 = vmatmul.mubr.msk.f32.vlgmr.msra.gmra.mxu0 %vm2228_vm11, %v2314_v19  ;;  %3216 = vmatprep.subr.mxu0 %v3796_v0  ;;  %v2660_v19 = vld [vmem:[%s4538_s14] sm:$0x1]  ;;  %s3707_s14 = scalar_lea.vmem %s3706_s24, 32 }
 0x5e0   : > { %3257 = vmatprep.subr.mxu1 %v3796_v0  ;;  %3217 = vmatpush3.msra.mxu0 %v2483_v1  ;;  %p3709_p3 = scmp.lt.s32.totalorder %s3707_s14, %s3701_s17 }
 0x5e1   : > { %3258 = vmatpush3.msra.mxu1 %v2559_v2  ;;  %3259 = vmatprep.mubr.msk.f32.mxu1 %vm3797_vm10, %v3796_v0 }
 0x5e2   : > { %3218 = vmatprep.subr.mxu0 %v3796_v0  ;;  %3260 = vmatmul.mubr.msk.f32.vlgmr.msra.gmra.mxu1 %vm2228_vm11, %v2569_v3  ;;  %p3710_p4 = por %p3709_p3, %p3708_p1 }
 0x5e3   : > { %3219 = vmatpush3.msra.mxu0 %v2482_v5  ;;  %3236 = vmatprep.mubr.msk.f32.mxu0 %vm3797_vm10, %v3796_v0 }
 0x5e4   : > { %3220 = vmatprep.subr.mxu0 %v3796_v0  ;;  %3297 = vmatprep.subr.mxu1 %v3796_v0  ;;  %p3711_p6 = pnand %p3710_p4, %p3704_p12 }
 0x5e5   : > { %3221 = vmatpush3.msra.mxu0 %v2481_v6  ;;  %3329 = vmatprep.mubr.msk.f32.mxu1 %vm3797_vm10, %v3796_v0  ;;  %v2748_v6 = vld [vmem:[%s4539_s26] sm:$0x1] }
 0x5e6   : > { %3222 = vmatprep.subr.mxu0 %v3796_v0  ;;  %3298 = vmatpush3.msra.mxu1 %v2747_v29 }
 0x5e7   : > { %3223 = vmatpush3.msra.mxu0 %v2480_v7  ;;  %3299 = vmatprep.subr.mxu1 %v3796_v0 }
 0x5e8   : > { %3224 = vmatprep.subr.mxu0 %v3796_v0  ;;  %3300 = vmatpush3.msra.mxu1 %v2746_v30 }
 0x5e9   : > { %3225 = vmatpush3.msra.mxu0 %v2479_v8  ;;  %3301 = vmatprep.subr.mxu1 %v3796_v0 }
 0x5ea   : > { %3226 = vmatprep.subr.mxu0 %v3796_v0  ;;  %3302 = vmatpush3.msra.mxu1 %v2745_v33 }
 0x5eb   : > { %3227 = vmatpush3.msra.mxu0 %v2478_v9  ;;  %3303 = vmatprep.subr.mxu1 %v3796_v0 }
 0x5ec   : > { %3228 = vmatprep.subr.mxu0 %v3796_v0  ;;  %3304 = vmatpush3.msra.mxu1 %v2744_v34 }
 0x5ed   : > { %3229 = vmatpush3.msra.mxu0 %v2477_v10  ;;  %3305 = vmatprep.subr.mxu1 %v3796_v0 }
 0x5ee   : > { %3230 = vmatprep.subr.mxu0 %v3796_v0  ;;  %3306 = vmatpush3.msra.mxu1 %v2743_v35 }
 0x5ef   : > { %3231 = vmatpush3.msra.mxu0 %v2476_v11  ;;  %3307 = vmatprep.subr.mxu1 %v3796_v0 }
 0x5f0   : > { %3232 = vmatprep.subr.mxu0 %v3796_v0  ;;  %3308 = vmatpush3.msra.mxu1 %v2742_v36 }
 0x5f1   : > { %3233 = vmatpush3.msra.mxu0 %v2475_v12  ;;  %3309 = vmatprep.subr.mxu1 %v3796_v0 }
 0x5f2   : > { %3234 = vmatprep.subr.mxu0 %v3796_v0  ;;  %3310 = vmatpush3.msra.mxu1 %v2741_v37 }
 0x5f3   : > { %3235 = vmatpush3.msra.mxu0 %v2474_v13  ;;  %3311 = vmatprep.subr.mxu1 %v3796_v0 }
 0x5f4   : > { %3237 = vmatmul.mubr.msk.f32.vlgmr.msra.gmra.mxu0 %vm2228_vm11, %v2484_v14  ;;  %3262 = vmatprep.subr.mxu0 %v3796_v0 }
 0x5f5   : > { %3294 = vmatprep.mubr.msk.f32.mxu0 %vm3797_vm10, %v3796_v0  ;;  %3263 = vmatpush3.msra.mxu0 %v2659_v46 }
 0x5f6   : > { %3264 = vmatprep.subr.mxu0 %v3796_v0  ;;  %3312 = vmatpush3.msra.mxu1 %v2740_v38 }
 0x5f7   : > { %3265 = vmatpush3.msra.mxu0 %v2658_v15  ;;  %3313 = vmatprep.subr.mxu1 %v3796_v0 }
 0x5f8   : > { %3266 = vmatprep.subr.mxu0 %v3796_v0  ;;  %3314 = vmatpush3.msra.mxu1 %v2739_v39 }
 0x5f9   : > { %3267 = vmatpush3.msra.mxu0 %v2657_v16  ;;  %3315 = vmatprep.subr.mxu1 %v3796_v0 }
 0x5fa   : > { %3268 = vmatprep.subr.mxu0 %v3796_v0  ;;  %3316 = vmatpush3.msra.mxu1 %v2738_v40 }
 0x5fb   : > { %3269 = vmatpush3.msra.mxu0 %v2656_v17  ;;  %3317 = vmatprep.subr.mxu1 %v3796_v0 }
 0x5fc   : > { %3270 = vmatprep.subr.mxu0 %v3796_v0  ;;  %3318 = vmatpush3.msra.mxu1 %v2737_v41 }
 0x5fd   : > { %3271 = vmatpush3.msra.mxu0 %v2655_v18  ;;  %3319 = vmatprep.subr.mxu1 %v3796_v0 }
 0x5fe   : > { %3272 = vmatprep.subr.mxu0 %v3796_v0  ;;  %3320 = vmatpush3.msra.mxu1 %v2736_v42 }
 0x5ff   : > { %3273 = vmatpush3.msra.mxu0 %v2654_v20  ;;  %3321 = vmatprep.subr.mxu1 %v3796_v0 }
 0x600   : > { %3274 = vmatprep.subr.mxu0 %v3796_v0  ;;  %3322 = vmatpush3.msra.mxu1 %v2735_v43 }
 0x601   : > { %3275 = vmatpush3.msra.mxu0 %v2653_v48  ;;  %3323 = vmatprep.subr.mxu1 %v3796_v0 }
 0x602   : > { %3276 = vmatprep.subr.mxu0 %v3796_v0  ;;  %3324 = vmatpush3.msra.mxu1 %v2734_v63 }
 0x603   : > { %3277 = vmatpush3.msra.mxu0 %v2652_v21  ;;  %3325 = vmatprep.subr.mxu1 %v3796_v0 }
 0x604   : > { %3278 = vmatprep.subr.mxu0 %v3796_v0  ;;  %3326 = vmatpush3.msra.mxu1 %v2733_v25 }
 0x605   : > { %3279 = vmatpush3.msra.mxu0 %v2651_v22  ;;  %3327 = vmatprep.subr.mxu1 %v3796_v0 }
 0x606   : > { %3280 = vmatprep.subr.mxu0 %v3796_v0  ;;  %3328 = vmatpush3.msra.mxu1 %v2732_v4 }
 0x607   : > { %3281 = vmatpush3.msra.mxu0 %v2650_v23 }
 0x608   : > { %3282 = vmatprep.subr.mxu0 %v3796_v0 }
 0x609   : > { %3283 = vmatpush3.msra.mxu0 %v2649_v24 }
 0x60a   : > { %3284 = vmatprep.subr.mxu0 %v3796_v0 }
 0x60b   : > { %3285 = vmatpush3.msra.mxu0 %v2648_v26 }
 0x60c   : > { %3286 = vmatprep.subr.mxu0 %v3796_v0 }
 0x60d   : > { %3287 = vmatpush3.msra.mxu0 %v2647_v27 }
 0x60e   : > { %3288 = vmatprep.subr.mxu0 %v3796_v0 }
 0x60f   : > { %3289 = vmatpush3.msra.mxu0 %v2646_v28 }
 0x610   : > { %3290 = vmatprep.subr.mxu0 %v3796_v0 }
 0x611   : > { %3291 = vmatpush3.msra.mxu0 %v2645_v31 }
 0x612   : > { %3292 = vmatprep.subr.mxu0 %v3796_v0 }
 0x613   : > { %3293 = vmatpush3.msra.mxu0 %v2644_v32 }
 0x68b   : > { %v2298_v44 = vpop.f32.mrf.mxu0 }
 0x68c   : > { %v2302_v55 = vadd.f32 %v2298_v44, %v2217_v54 }
 0x68d   : > { %v3169_v45 = vpop.f32.mrf.mxu0  ;;  %v2468_v47 = vpop.f32.mrf.mxu1 }
 0x68f   : > { %v3215_v49 = vpop.f32.mrf.mxu1 }
 0x69f   : > { %v2383_v50 = vpop.f32.mrf.mxu0 }
 0x6a0   : > { %v2387_v56 = vadd.f32 %v2383_v50, %v2302_v55 }
 0x6a1   : > { %v3192_v51 = vpop.f32.mrf.mxu0 }
 0x6a2   : > { %v2638_v52 = vpop.f32.mrf.mxu1  ;;  %v2472_v57 = vadd.f32 %v2468_v47, %v2387_v56 }
 0x6a4   : > { %v3261_v53 = vpop.f32.mrf.mxu1 }
 0x6b4   : > { %v2553_v59 = vpop.f32.mrf.mxu0 }
 0x6b5   : > { %v2557_v60 = vadd.f32 %v2553_v59, %v2472_v57 }
 0x6b6   : > { %v3238_v58 = vpop.f32.mrf.mxu0 }
 0x6b7   : > { %v2642_v61 = vadd.f32 %v2638_v52, %v2557_v60 }
 0x6b9   : > { %v2643_v62 = vmax.f32 %v2642_v61, 0.0 }
 0x6bb   : > { %3295 = vmatmul.mubr.f32.vlgmr.msra.gmra.mxu0 %v2643_v62 }
 0x77b   : > { %v2727_v1 = vpop.f32.mrf.mxu0 }
 0x77c   : > { %v2728_v2 = vadd.f32 %v2727_v1, %v2660_v19 }
 0x77d   : > { %v3296_v3 = vpop.f32.mrf.mxu0 }
 0x77e   : > { %v2731_v5 = vmax.f32 %v2728_v2, 0.0 }
 0x780   : > { %3330 = vmatmul.mubr.f32.vlgmr.msra.gmra.mxu1 %v2731_v5 }
 0x840   : > { %v2815_v0 = vpop.f32.mrf.mxu1 }
 0x841   : > { %v2816_v7 = vadd.f32 %v2815_v0, %v2748_v6 }
 0x842   : > { %v3331_v8 = vpop.f32.mrf.mxu1 }
 0x843   : > { %2819 = vst [vmem:[%s627_s4] sm:$0x1] %v2816_v7 }
 0x844   : > { %3714 = shalt.err (!%p3711_p6)
}
 0x845   : > { %s3715_s9 = scalar_lea.hbm %s4439_s22, 16  ;;  %s3719_s26 = scalar_lea.hbm %s4540_s15, 32 }
 0x846   : > { %p3716_p8 = scmp.ne.s32.totalorder %s4439_s22, %s3715_s9  ;;  %p3720_p11 = scmp.lt.s32.totalorder %s4439_s22, %s4540_s15 }
 0x847   : > { %p3721_p13 = scmp.lt.s32.totalorder %s3719_s26, %s3715_s9 }
 0x848   : > { %p3717_p10 = pnand %p3716_p8, %p4541_p5 }
 0x849   : > { %p3722_p0 = por %p3721_p13, %p3720_p11 }
 0x84a   : > { %p3718_p7 = pneg %p3717_p10 }
 0x84c   : > { %p3723_p2 = pnand %p3722_p0, %p3718_p7 }
 0x84e   : > { %3726 = shalt.err (!%p3723_p2)
}
 0x84f   : > { %3366 = dma.vmem_to_hbm [thread:$0]  (%p4541_p5), %s2834_s5, 16, %s4439_s22, %s2821_s29  }
 0x850 PF: > { %s2845_s12 = sand.u32 1, %s3769_s18   ;;  %p4542_p9 = scmp.ne.s32.totalorder %s4524_s27, 0 }
 0x851   : > { %p4543_p12 = scmp.ge.s32.totalorder %s3781_s21, 2  ;;  %s2846_s25 = scalar_lea.sflag [#allocation4], %s2845_s12 }
 0x853   : > { %p3398_p1 = pnand %p4543_p12, %p4542_p9 }
 0x855   : > { %p3399_p3 = pneg %p3398_p1 }
 0x857   : > { %3764 = dma.done.wait (%p3399_p3), %s2846_s25, 16  }
 0x858   : > { %3766 = vsyncadd (%p3399_p3), %s2846_s25, 4294967280  ;;  %p32_p4 = scmp.ge.s32.totalorder %s4016_s16, 4   ;;  %s4544_s18 = smov %s3773_s19 }
 0x859   : > { %s4545_s19 = smov %s3777_s20  ;;  %s4546_s20 = smov %s4027_s23 }
 0x85a   : > { %s4547_s21 = smov %s4016_s16  ;;  %34 = sbr.rel (!%p32_p4) target bundleno = 19 (0x13), region = 169 }
 0x85f   :  { %2850 = vsyncpa [#allocation3], 1 }
 0x860   :  { %2852 = vsyncpa [#allocation3 + $0x1], 1 }
 0x861   :  { %2853 = vsyncpa [#allocation6], 1 }
 0x862   :  { %2854 = vsyncpa [#allocation9], 1 }
 0x863   :  { %2855 = vsyncpa [#allocation12], 1 }
 0x864   :  { %2856 = vsyncpa [#allocation15], 1 }
 0x865   :  { %2857 = vsyncpa [#allocation4], 1 }
 0x866   :  { %2859 = vsyncpa [#allocation4 + $0x1], 1 }

</bundles_post_ra>
